<compile_context>
chip_gen: v5e
topology: v5e:2x2
jax: 0.10.0
libtpu: 0.0.40
codegen_flags: <defaults>
</compile_context>

<pallas_src>
import functools

import jax
import jax.numpy as jnp
import numpy as np
from jax.experimental import pallas as pl
from jax.experimental.pallas import tpu as pltpu


def _round_up(a, b):
    return (a + b - 1) // b * b


def _cdiv(a, b):
    return -(-a // b)


def _spectral_conv1d_kernel(x_ref, f_ref, w_ref, a_ref, o_ref, z_scr, stage_scr,
                            *, c_in, c_out, m_pad, b_tile, fused_relayout):
    """One batch tile.

    x_ref     : (c_in*b_tile, N)          channel-major fused input slab
    f_ref     : (2*m_pad, N)              fused rDFT analysis basis [cos; -sin]
    w_ref     : (m_pad, 2*c_out, 2*c_in)  per-mode complex mixing matrices
    a_ref     : (2*m_pad, N)              fused irfft synthesis basis
    o_ref     : (c_out*b_tile, N)         channel-major fused output slab
    z_scr     : (m_pad, 2*c_in, b_tile)   spectrum, mode-major scratch
    stage_scr : (2*m_pad, c_out*b_tile)   mixed spectrum, synthesis staging
    """
    # ---- analysis: one fused (real|imag) rDFT matmul for all channels ----
    z2 = jax.lax.dot_general(
        f_ref[...], x_ref[...], (((1,), (1,)), ((), ())),
        preferred_element_type=jnp.float32)              # (2*m_pad, c_in*b_tile)

    if fused_relayout:
        z_scr[:, :c_in, :] = z2[:m_pad, :].reshape(m_pad, c_in, b_tile).astype(z_scr.dtype)
        z_scr[:, c_in:, :] = z2[m_pad:, :].reshape(m_pad, c_in, b_tile).astype(z_scr.dtype)
    else:
        for i in range(c_in):
            sl = slice(i * b_tile, (i + 1) * b_tile)
            z_scr[:, i, :] = z2[:m_pad, sl].astype(z_scr.dtype)
            z_scr[:, c_in + i, :] = z2[m_pad:, sl].astype(z_scr.dtype)

    # ---- per-mode complex channel mixing, mode-batched on the MXU ----
    y = jax.lax.dot_general(
        w_ref[...], z_scr[...],
        (((2,), (1,)), ((0,), (0,))),                    # batch: mode, contract: 2*c_in
        preferred_element_type=jnp.float32)              # (m_pad, 2*c_out, b_tile)

    if fused_relayout:
        stage_scr[:m_pad, :] = y[:, :c_out, :].reshape(m_pad, c_out * b_tile).astype(stage_scr.dtype)
        stage_scr[m_pad:, :] = y[:, c_out:, :].reshape(m_pad, c_out * b_tile).astype(stage_scr.dtype)
    else:
        for o in range(c_out):
            sl = slice(o * b_tile, (o + 1) * b_tile)
            stage_scr[:m_pad, sl] = y[:, o, :].astype(stage_scr.dtype)
            stage_scr[m_pad:, sl] = y[:, c_out + o, :].astype(stage_scr.dtype)

    # ---- synthesis: one fused (real|imag) irfft matmul for all channels ----
    out = jax.lax.dot_general(
        stage_scr[...], a_ref[...], (((0,), (0,)), ((), ())),
        preferred_element_type=jnp.float32)              # (c_out*b_tile, N)
    o_ref[...] = out.astype(o_ref.dtype)


def _pick_b_tile(c_in, c_out, N, m_pad, itemsize, budget_bytes):
    """Largest multiple-of-8 batch tile whose pipelined blocks + scratch fit."""
    # Grid-invariant operands (F2, A2, W); assume worst-case double buffering.
    fixed = (2 * (2 * m_pad) * N + m_pad * 4 * c_in * c_out) * 2 * itemsize
    # Per batch row: double-buffered x/out blocks, matmul temporaries, scratch.
    per_b = (3 * (c_in + c_out) * N) * itemsize + 2 * m_pad * (c_in + 2 * c_out) * itemsize
    b = (budget_bytes - fixed) // max(per_b, 1)
    return int(max(8, min(b // 8 * 8, 1024)))


def spectral_conv1d_forward(x, real_w, imag_w, modes, *, b_tile=None,
                            compute_dtype=jnp.float32):
    """x: (B, Cin, N).  real_w/imag_w: (Cin, Cout, modes).  Returns (B, Cout, N)."""
    B, c_in, N = x.shape
    c_out = real_w.shape[1]
    assert 1 <= modes <= N // 2 + 1, "modes must not exceed the number of rfft bins"

    out_dtype = x.dtype
    itemsize = np.dtype(compute_dtype).itemsize
    m_pad = _round_up(modes, 8)                     # sublane-aligned mode count

    # -------- VMEM budget / tile selection (generation-aware) --------
    try:
        vmem_cap = int(pltpu.get_tpu_info().vmem_capacity_bytes)
    except Exception:
        vmem_cap = 64 * 1024 * 1024                 # conservative (v7x-sized) default
    vmem_limit = max(32 * 1024 * 1024, min(int(vmem_cap * 0.8), 112 * 1024 * 1024))
    budget = int(vmem_limit * 0.85)

    if b_tile is None:
        b_tile = _pick_b_tile(c_in, c_out, N, m_pad, itemsize, budget)
        if _round_up(B, 8) >= 16:
            # Keep >=2 batch tiles so the "parallel" axis can shard across
            # v7x's two TensorCores (neutral on single-TC v5e/v6e).
            b_tile = min(b_tile, _round_up(_cdiv(B, 2), 8))
    b_tile = max(8, _round_up(min(b_tile, _round_up(B, 8)), 8))
    n_tiles = _cdiv(B, b_tile)
    b_padded = n_tiles * b_tile

    # -------- host-side constant setup (constant-folded under jit) --------
    m_idx = np.arange(m_pad)
    n_idx = np.arange(N)
    theta = 2.0 * np.pi * np.outer(m_idx, n_idx) / N            # (m_pad, N)
    live = (m_idx < modes)[:, None]

    # Fused analysis basis: rows [0, m_pad) real (cos), [m_pad, 2*m_pad) imag (-sin).
    f2 = np.zeros((2 * m_pad, N), np.float64)
    f2[:m_pad] = np.where(live, np.cos(theta), 0.0)
    f2[m_pad:] = np.where(live, -np.sin(theta), 0.0)

    # Fused irfft synthesis basis (DC / Nyquist bins are not doubled).
    wgt = np.where(m_idx == 0, 1.0, 2.0)
    if N % 2 == 0:
        wgt = np.where(m_idx == N // 2, 1.0, wgt)
    a2 = np.zeros((2 * m_pad, N), np.float64)
    a2[:m_pad] = np.where(live, (wgt[:, None] * np.cos(theta)) / N, 0.0)
    a2[m_pad:] = np.where(live, (-wgt[:, None] * np.sin(theta)) / N, 0.0)

    f2 = jnp.asarray(f2, compute_dtype)
    a2 = jnp.asarray(a2, compute_dtype)

    # Per-mode mixing matrices: [or; oi] = [[wr, -wi], [wi, wr]] @ [zr; zi].
    wr = jnp.transpose(real_w.astype(jnp.float32), (2, 1, 0))   # (modes, c_out, c_in)
    wi = jnp.transpose(imag_w.astype(jnp.float32), (2, 1, 0))
    wmix = jnp.zeros((m_pad, 2 * c_out, 2 * c_in), jnp.float32)
    wmix = wmix.at[:modes, :c_out, :c_in].set(wr)
    wmix = wmix.at[:modes, :c_out, c_in:].set(-wi)
    wmix = wmix.at[:modes, c_out:, :c_in].set(wi)
    wmix = wmix.at[:modes, c_out:, c_in:].set(wr)
    wmix = wmix.astype(compute_dtype)

    # Input relayout: (B, Cin, N) -> (n_tiles, Cin*b_tile, N), channel-major per tile.
    if b_padded != B:
        xp = jnp.zeros((b_padded, c_in, N), compute_dtype).at[:B].set(x.astype(compute_dtype))
    else:
        xp = x.astype(compute_dtype)
    xp = xp.reshape(n_tiles, b_tile, c_in, N).transpose(0, 2, 1, 3)
    xp = xp.reshape(n_tiles, c_in * b_tile, N)

    def _build(fused_relayout, single_buffer_consts):
        const_kwargs = dict(pipeline_mode=pl.Buffered(1)) if single_buffer_consts else {}
        kernel = functools.partial(
            _spectral_conv1d_kernel, c_in=c_in, c_out=c_out, m_pad=m_pad,
            b_tile=b_tile, fused_relayout=fused_relayout)
        return pl.pallas_call(
            kernel,
            out_shape=jax.ShapeDtypeStruct((n_tiles, c_out * b_tile, N), out_dtype),
            grid=(n_tiles,),
            in_specs=[
                pl.BlockSpec((None, c_in * b_tile, N), lambda t: (t, 0, 0)),
                # Grid-invariant operands (constant index_map, single-buffered).
                pl.BlockSpec((2 * m_pad, N), lambda t: (0, 0), **const_kwargs),
                pl.BlockSpec((m_pad, 2 * c_out, 2 * c_in), lambda t: (0, 0, 0),
                             **const_kwargs),
                pl.BlockSpec((2 * m_pad, N), lambda t: (0, 0), **const_kwargs),
            ],
            out_specs=pl.BlockSpec((None, c_out * b_tile, N), lambda t: (t, 0, 0)),
            scratch_shapes=[
                pltpu.VMEM((m_pad, 2 * c_in, b_tile), compute_dtype),
                pltpu.VMEM((2 * m_pad, c_out * b_tile), compute_dtype),
            ],
            compiler_params=pltpu.CompilerParams(
                dimension_semantics=("parallel",),
                vmem_limit_bytes=vmem_limit),
        )

    try:
        out = _build(True, True)(xp, f2, wmix, a2)
    except Exception:
        # Conservative fallback: per-channel slice stores instead of the
        # lane-splitting block reshapes, and default double buffering
        # (handles Mosaic builds without pl.Buffered(1) / general reshapes).
        out = _build(False, False)(xp, f2, wmix, a2)

    # (n_tiles, c_out*b_tile, N) -> (B, c_out, N)
    out = out.reshape(n_tiles, c_out, b_tile, N).transpose(0, 2, 1, 3)
    out = out.reshape(b_padded, c_out, N)
    return out[:B]


def spectral_conv1d_reference(x, real_w, imag_w, modes):
    """Pure-JAX reference mirroring the PyTorch SpectralConv1d forward."""
    B, c_in, N = x.shape
    c_out = real_w.shape[1]
    x_hat = jnp.fft.rfft(x.astype(jnp.float32), axis=-1)[:, :, :modes]
    w = real_w.astype(jnp.complex64) + 1j * imag_w.astype(jnp.complex64)
    out_hat = jnp.einsum('bim,iom->bom', x_hat, w)
    full = jnp.zeros((B, c_out, N // 2 + 1), jnp.complex64)
    full = full.at[:, :, :modes].set(out_hat)
    return jnp.fft.irfft(full, n=N, axis=-1).astype(jnp.float32)


if __name__ == "__main__":
    B, c_in, c_out, N, modes = 2, 4, 4, 16, 5

    key = jax.random.PRNGKey(0)
    k1, k2, k3 = jax.random.split(key, 3)
    # SpectralConv1d params: torch.randn(n_in, n_out, modes)
    real_w = jax.random.normal(k1, (c_in, c_out, modes), dtype=jnp.float32)
    imag_w = jax.random.normal(k2, (c_in, c_out, modes), dtype=jnp.float32)
    x = jax.random.normal(k3, (B, c_in, N), dtype=jnp.float32)

    out = spectral_conv1d_forward(x, real_w, imag_w, modes)
    out = jax.block_until_ready(out)

    ref = spectral_conv1d_reference(x, real_w, imag_w, modes)
    assert out.shape == (B, c_out, N), out.shape
    scale = max(1.0, float(jnp.max(jnp.abs(ref))))
    max_err = float(jnp.max(jnp.abs(out - ref)))
    assert max_err <= 2e-3 * scale, f"max_err={max_err}, scale={scale}"

    print("KERNEL_OK")
</pallas_src>

<mosaic_0001>
module attributes {stable_mosaic.version = 11 : i64} {
  func.func @_spectral_conv1d_kernel(%arg0: i32, %arg1: memref<1x32x16xf32, #tpu.memory_space<vmem>>, %arg2: memref<16x16xf32, #tpu.memory_space<vmem>>, %arg3: memref<8x8x8xf32, #tpu.memory_space<vmem>>, %arg4: memref<16x16xf32, #tpu.memory_space<vmem>>, %arg5: memref<1x32x16xf32, #tpu.memory_space<vmem>>, %arg6: memref<8x8x8xf32, #tpu.memory_space<vmem>>, %arg7: memref<16x32xf32, #tpu.memory_space<vmem>>) attributes {dimension_semantics = [#tpu.dimension_semantics<parallel>], iteration_bounds = array<i64: 1>, scalar_prefetch = 0 : i64, scratch_operands = 2 : i64, tpu.core_type = #tpu.core_type<tc>, window_params = [{transform_indices = @transform_0, window_bounds = array<i64: 1, 32, 16>}, {pipeline_mode = #tpu.pipeline_mode<synchronous>, transform_indices = @transform_1, window_bounds = array<i64: 16, 16>}, {pipeline_mode = #tpu.pipeline_mode<synchronous>, transform_indices = @transform_2, window_bounds = array<i64: 8, 8, 8>}, {pipeline_mode = #tpu.pipeline_mode<synchronous>, transform_indices = @transform_3, window_bounds = array<i64: 16, 16>}, {transform_indices = @transform_4, window_bounds = array<i64: 1, 32, 16>}]} {
    %c0 = arith.constant 0 : index
    %c0_0 = arith.constant 0 : index
    %0 = vector.load %arg2[%c0, %c0_0] : memref<16x16xf32, #tpu.memory_space<vmem>>, vector<16x16xf32>
    %c0_1 = arith.constant 0 : index
    %c0_2 = arith.constant 0 : index
    %c0_3 = arith.constant 0 : index
    %1 = vector.load %arg1[%c0_1, %c0_2, %c0_3] : memref<1x32x16xf32, #tpu.memory_space<vmem>>, vector<1x32x16xf32>
    %2 = vector.shape_cast %1 : vector<1x32x16xf32> to vector<32x16xf32>
    %cst = arith.constant dense<0.000000e+00> : vector<16x32xf32>
    %3 = tpu.matmul %0, %2, %cst {dimension_numbers = #tpu.dot_dimension_numbers<[1], [1], [0], [0], [0, 0, 1, 0], [], []>} : vector<16x16xf32>, vector<32x16xf32>, vector<16x32xf32> -> vector<16x32xf32>
    %4 = vector.extract_strided_slice %3 {offsets = [0, 0], sizes = [8, 32], strides = [1, 1]} : vector<16x32xf32> to vector<8x32xf32>
    %5 = vector.shape_cast %4 : vector<8x32xf32> to vector<8x4x8xf32>
    %c0_4 = arith.constant 0 : index
    %c0_5 = arith.constant 0 : index
    %c0_6 = arith.constant 0 : index
    %6 = vector.load %arg6[%c0_4, %c0_5, %c0_6] : memref<8x8x8xf32, #tpu.memory_space<vmem>>, vector<8x4x8xf32>
    tpu.vector_store %arg6[%c0_4, %c0_5, %c0_6], %5 {strides = array<i32>} : memref<8x8x8xf32, #tpu.memory_space<vmem>>, vector<8x4x8xf32>,
    %7 = vector.extract_strided_slice %3 {offsets = [8, 0], sizes = [8, 32], strides = [1, 1]} : vector<16x32xf32> to vector<8x32xf32>
    %8 = vector.shape_cast %7 : vector<8x32xf32> to vector<8x4x8xf32>
    %c0_7 = arith.constant 0 : index
    %c4 = arith.constant 4 : index
    %c0_8 = arith.constant 0 : index
    %9 = vector.load %arg6[%c0_7, %c4, %c0_8] : memref<8x8x8xf32, #tpu.memory_space<vmem>>, vector<8x4x8xf32>
    tpu.vector_store %arg6[%c0_7, %c4, %c0_8], %8 {strides = array<i32>} : memref<8x8x8xf32, #tpu.memory_space<vmem>>, vector<8x4x8xf32>,
    %c0_9 = arith.constant 0 : index
    %c0_10 = arith.constant 0 : index
    %c0_11 = arith.constant 0 : index
    %10 = vector.load %arg3[%c0_9, %c0_10, %c0_11] : memref<8x8x8xf32, #tpu.memory_space<vmem>>, vector<8x8x8xf32>
    %c0_12 = arith.constant 0 : index
    %c0_13 = arith.constant 0 : index
    %c0_14 = arith.constant 0 : index
    %11 = vector.load %arg6[%c0_12, %c0_13, %c0_14] : memref<8x8x8xf32, #tpu.memory_space<vmem>>, vector<8x8x8xf32>
    %cst_15 = arith.constant dense<0.000000e+00> : vector<8x8x8xf32>
    %12 = tpu.matmul %10, %11, %cst_15 {dimension_numbers = #tpu.dot_dimension_numbers<[2], [1], [1], [2], [0, 0, 0, 1, 1, 2], [0], [0]>} : vector<8x8x8xf32>, vector<8x8x8xf32>, vector<8x8x8xf32> -> vector<8x8x8xf32>
    %13 = vector.extract_strided_slice %12 {offsets = [0, 0, 0], sizes = [8, 4, 8], strides = [1, 1, 1]} : vector<8x8x8xf32> to vector<8x4x8xf32>
    %14 = vector.shape_cast %13 : vector<8x4x8xf32> to vector<8x32xf32>
    %c0_16 = arith.constant 0 : index
    %c0_17 = arith.constant 0 : index
    %15 = vector.load %arg7[%c0_16, %c0_17] : memref<16x32xf32, #tpu.memory_space<vmem>>, vector<8x32xf32>
    tpu.vector_store %arg7[%c0_16, %c0_17], %14 {strides = array<i32>} : memref<16x32xf32, #tpu.memory_space<vmem>>, vector<8x32xf32>,
    %16 = vector.extract_strided_slice %12 {offsets = [0, 4, 0], sizes = [8, 4, 8], strides = [1, 1, 1]} : vector<8x8x8xf32> to vector<8x4x8xf32>
    %17 = vector.shape_cast %16 : vector<8x4x8xf32> to vector<8x32xf32>
    %c8 = arith.constant 8 : index
    %c0_18 = arith.constant 0 : index
    %18 = vector.load %arg7[%c8, %c0_18] : memref<16x32xf32, #tpu.memory_space<vmem>>, vector<8x32xf32>
    tpu.vector_store %arg7[%c8, %c0_18], %17 {strides = array<i32>} : memref<16x32xf32, #tpu.memory_space<vmem>>, vector<8x32xf32>,
    %c0_19 = arith.constant 0 : index
    %c0_20 = arith.constant 0 : index
    %19 = vector.load %arg7[%c0_19, %c0_20] : memref<16x32xf32, #tpu.memory_space<vmem>>, vector<16x32xf32>
    %c0_21 = arith.constant 0 : index
    %c0_22 = arith.constant 0 : index
    %20 = vector.load %arg4[%c0_21, %c0_22] : memref<16x16xf32, #tpu.memory_space<vmem>>, vector<16x16xf32>
    %cst_23 = arith.constant dense<0.000000e+00> : vector<32x16xf32>
    %21 = tpu.matmul %19, %20, %cst_23 {dimension_numbers = #tpu.dot_dimension_numbers<[0], [0], [1], [1], [0, 1, 1, 1], [], []>} : vector<16x32xf32>, vector<16x16xf32>, vector<32x16xf32> -> vector<32x16xf32>
    %c0_24 = arith.constant 0 : index
    %c0_25 = arith.constant 0 : index
    %c0_26 = arith.constant 0 : index
    %22 = vector.load %arg5[%c0_24, %c0_25, %c0_26] : memref<1x32x16xf32, #tpu.memory_space<vmem>>, vector<1x32x16xf32>
    %23 = vector.shape_cast %22 : vector<1x32x16xf32> to vector<32x16xf32>
    %24 = vector.shape_cast %21 : vector<32x16xf32> to vector<1x32x16xf32>
    tpu.vector_store %arg5[%c0_24, %c0_25, %c0_26], %24 {strides = array<i32>} : memref<1x32x16xf32, #tpu.memory_space<vmem>>, vector<1x32x16xf32>,
    return
  }
  func.func @transform_0(%arg0: i32) -> (i32, i32, i32) {
    %c0_i32 = arith.constant 0 : i32
    %c0_i32_0 = arith.constant 0 : i32
    %c0_i32_1 = arith.constant 0 : i32
    return %arg0, %c0_i32, %c0_i32_0 : i32, i32, i32
  }
  func.func @transform_1(%arg0: i32) -> (i32, i32) {
    %c0_i32 = arith.constant 0 : i32
    %c0_i32_0 = arith.constant 0 : i32
    %c0_i32_1 = arith.constant 0 : i32
    return %c0_i32, %c0_i32_0 : i32, i32
  }
  func.func @transform_2(%arg0: i32) -> (i32, i32, i32) {
    %c0_i32 = arith.constant 0 : i32
    %c0_i32_0 = arith.constant 0 : i32
    %c0_i32_1 = arith.constant 0 : i32
    %c0_i32_2 = arith.constant 0 : i32
    return %c0_i32, %c0_i32_0, %c0_i32_1 : i32, i32, i32
  }
  func.func @transform_3(%arg0: i32) -> (i32, i32) {
    %c0_i32 = arith.constant 0 : i32
    %c0_i32_0 = arith.constant 0 : i32
    %c0_i32_1 = arith.constant 0 : i32
    return %c0_i32, %c0_i32_0 : i32, i32
  }
  func.func @transform_4(%arg0: i32) -> (i32, i32, i32) {
    %c0_i32 = arith.constant 0 : i32
    %c0_i32_0 = arith.constant 0 : i32
    %c0_i32_1 = arith.constant 0 : i32
    return %arg0, %c0_i32, %c0_i32_0 : i32, i32, i32
  }
}

module attributes {stable_mosaic.version = 11 : i64} {
  func.func @_spectral_conv1d_kernel(%arg0: i32, %arg1: memref<1x32x16xf32, #tpu.memory_space<vmem>>, %arg2: memref<16x16xf32, #tpu.memory_space<vmem>>, %arg3: memref<8x8x8xf32, #tpu.memory_space<vmem>>, %arg4: memref<16x16xf32, #tpu.memory_space<vmem>>, %arg5: memref<1x32x16xf32, #tpu.memory_space<vmem>>, %arg6: memref<8x8x8xf32, #tpu.memory_space<vmem>>, %arg7: memref<16x32xf32, #tpu.memory_space<vmem>>) attributes {dimension_semantics = [#tpu.dimension_semantics<parallel>], iteration_bounds = array<i64: 1>, scalar_prefetch = 0 : i64, scratch_operands = 2 : i64, tpu.core_type = #tpu.core_type<tc>, window_params = [{transform_indices = @transform_0, window_bounds = array<i64: 1, 32, 16>}, {pipeline_mode = #tpu.pipeline_mode<synchronous>, transform_indices = @transform_1, window_bounds = array<i64: 16, 16>}, {pipeline_mode = #tpu.pipeline_mode<synchronous>, transform_indices = @transform_2, window_bounds = array<i64: 8, 8, 8>}, {pipeline_mode = #tpu.pipeline_mode<synchronous>, transform_indices = @transform_3, window_bounds = array<i64: 16, 16>}, {transform_indices = @transform_4, window_bounds = array<i64: 1, 32, 16>}]} {
    %c0 = arith.constant 0 : index
    %c0_0 = arith.constant 0 : index
    %0 = vector.load %arg2[%c0, %c0_0] : memref<16x16xf32, #tpu.memory_space<vmem>>, vector<16x16xf32>
    %c0_1 = arith.constant 0 : index
    %c0_2 = arith.constant 0 : index
    %c0_3 = arith.constant 0 : index
    %1 = vector.load %arg1[%c0_1, %c0_2, %c0_3] : memref<1x32x16xf32, #tpu.memory_space<vmem>>, vector<1x32x16xf32>
    %2 = vector.shape_cast %1 : vector<1x32x16xf32> to vector<32x16xf32>
    %cst = arith.constant dense<0.000000e+00> : vector<16x32xf32>
    %3 = tpu.matmul %0, %2, %cst {dimension_numbers = #tpu.dot_dimension_numbers<[1], [1], [0], [0], [0, 0, 1, 0], [], []>} : vector<16x16xf32>, vector<32x16xf32>, vector<16x32xf32> -> vector<16x32xf32>
    %4 = vector.extract_strided_slice %3 {offsets = [0, 0], sizes = [8, 8], strides = [1, 1]} : vector<16x32xf32> to vector<8x8xf32>
    %c0_4 = arith.constant 0 : index
    %c0_5 = arith.constant 0 : index
    %c0_6 = arith.constant 0 : index
    %5 = vector.load %arg6[%c0_4, %c0_5, %c0_6] : memref<8x8x8xf32, #tpu.memory_space<vmem>>, vector<8x1x8xf32>
    %6 = vector.shape_cast %5 : vector<8x1x8xf32> to vector<8x8xf32>
    %7 = vector.shape_cast %4 : vector<8x8xf32> to vector<8x1x8xf32>
    tpu.vector_store %arg6[%c0_4, %c0_5, %c0_6], %7 {strides = array<i32>} : memref<8x8x8xf32, #tpu.memory_space<vmem>>, vector<8x1x8xf32>,
    %8 = vector.extract_strided_slice %3 {offsets = [8, 0], sizes = [8, 8], strides = [1, 1]} : vector<16x32xf32> to vector<8x8xf32>
    %c0_7 = arith.constant 0 : index
    %c4 = arith.constant 4 : index
    %c0_8 = arith.constant 0 : index
    %9 = vector.load %arg6[%c0_7, %c4, %c0_8] : memref<8x8x8xf32, #tpu.memory_space<vmem>>, vector<8x1x8xf32>
    %10 = vector.shape_cast %9 : vector<8x1x8xf32> to vector<8x8xf32>
    %11 = vector.shape_cast %8 : vector<8x8xf32> to vector<8x1x8xf32>
    tpu.vector_store %arg6[%c0_7, %c4, %c0_8], %11 {strides = array<i32>} : memref<8x8x8xf32, #tpu.memory_space<vmem>>, vector<8x1x8xf32>,
    %12 = vector.extract_strided_slice %3 {offsets = [0, 8], sizes = [8, 8], strides = [1, 1]} : vector<16x32xf32> to vector<8x8xf32>
    %c0_9 = arith.constant 0 : index
    %c1 = arith.constant 1 : index
    %c0_10 = arith.constant 0 : index
    %13 = vector.load %arg6[%c0_9, %c1, %c0_10] : memref<8x8x8xf32, #tpu.memory_space<vmem>>, vector<8x1x8xf32>
    %14 = vector.shape_cast %13 : vector<8x1x8xf32> to vector<8x8xf32>
    %15 = vector.shape_cast %12 : vector<8x8xf32> to vector<8x1x8xf32>
    tpu.vector_store %arg6[%c0_9, %c1, %c0_10], %15 {strides = array<i32>} : memref<8x8x8xf32, #tpu.memory_space<vmem>>, vector<8x1x8xf32>,
    %16 = vector.extract_strided_slice %3 {offsets = [8, 8], sizes = [8, 8], strides = [1, 1]} : vector<16x32xf32> to vector<8x8xf32>
    %c0_11 = arith.constant 0 : index
    %c5 = arith.constant 5 : index
    %c0_12 = arith.constant 0 : index
    %17 = vector.load %arg6[%c0_11, %c5, %c0_12] : memref<8x8x8xf32, #tpu.memory_space<vmem>>, vector<8x1x8xf32>
    %18 = vector.shape_cast %17 : vector<8x1x8xf32> to vector<8x8xf32>
    %19 = vector.shape_cast %16 : vector<8x8xf32> to vector<8x1x8xf32>
    tpu.vector_store %arg6[%c0_11, %c5, %c0_12], %19 {strides = array<i32>} : memref<8x8x8xf32, #tpu.memory_space<vmem>>, vector<8x1x8xf32>,
    %20 = vector.extract_strided_slice %3 {offsets = [0, 16], sizes = [8, 8], strides = [1, 1]} : vector<16x32xf32> to vector<8x8xf32>
    %c0_13 = arith.constant 0 : index
    %c2 = arith.constant 2 : index
    %c0_14 = arith.constant 0 : index
    %21 = vector.load %arg6[%c0_13, %c2, %c0_14] : memref<8x8x8xf32, #tpu.memory_space<vmem>>, vector<8x1x8xf32>
    %22 = vector.shape_cast %21 : vector<8x1x8xf32> to vector<8x8xf32>
    %23 = vector.shape_cast %20 : vector<8x8xf32> to vector<8x1x8xf32>
    tpu.vector_store %arg6[%c0_13, %c2, %c0_14], %23 {strides = array<i32>} : memref<8x8x8xf32, #tpu.memory_space<vmem>>, vector<8x1x8xf32>,
    %24 = vector.extract_strided_slice %3 {offsets = [8, 16], sizes = [8, 8], strides = [1, 1]} : vector<16x32xf32> to vector<8x8xf32>
    %c0_15 = arith.constant 0 : index
    %c6 = arith.constant 6 : index
    %c0_16 = arith.constant 0 : index
    %25 = vector.load %arg6[%c0_15, %c6, %c0_16] : memref<8x8x8xf32, #tpu.memory_space<vmem>>, vector<8x1x8xf32>
    %26 = vector.shape_cast %25 : vector<8x1x8xf32> to vector<8x8xf32>
    %27 = vector.shape_cast %24 : vector<8x8xf32> to vector<8x1x8xf32>
    tpu.vector_store %arg6[%c0_15, %c6, %c0_16], %27 {strides = array<i32>} : memref<8x8x8xf32, #tpu.memory_space<vmem>>, vector<8x1x8xf32>,
    %28 = vector.extract_strided_slice %3 {offsets = [0, 24], sizes = [8, 8], strides = [1, 1]} : vector<16x32xf32> to vector<8x8xf32>
    %c0_17 = arith.constant 0 : index
    %c3 = arith.constant 3 : index
    %c0_18 = arith.constant 0 : index
    %29 = vector.load %arg6[%c0_17, %c3, %c0_18] : memref<8x8x8xf32, #tpu.memory_space<vmem>>, vector<8x1x8xf32>
    %30 = vector.shape_cast %29 : vector<8x1x8xf32> to vector<8x8xf32>
    %31 = vector.shape_cast %28 : vector<8x8xf32> to vector<8x1x8xf32>
    tpu.vector_store %arg6[%c0_17, %c3, %c0_18], %31 {strides = array<i32>} : memref<8x8x8xf32, #tpu.memory_space<vmem>>, vector<8x1x8xf32>,
    %32 = vector.extract_strided_slice %3 {offsets = [8, 24], sizes = [8, 8], strides = [1, 1]} : vector<16x32xf32> to vector<8x8xf32>
    %c0_19 = arith.constant 0 : index
    %c7 = arith.constant 7 : index
    %c0_20 = arith.constant 0 : index
    %33 = vector.load %arg6[%c0_19, %c7, %c0_20] : memref<8x8x8xf32, #tpu.memory_space<vmem>>, vector<8x1x8xf32>
    %34 = vector.shape_cast %33 : vector<8x1x8xf32> to vector<8x8xf32>
    %35 = vector.shape_cast %32 : vector<8x8xf32> to vector<8x1x8xf32>
    tpu.vector_store %arg6[%c0_19, %c7, %c0_20], %35 {strides = array<i32>} : memref<8x8x8xf32, #tpu.memory_space<vmem>>, vector<8x1x8xf32>,
    %c0_21 = arith.constant 0 : index
    %c0_22 = arith.constant 0 : index
    %c0_23 = arith.constant 0 : index
    %36 = vector.load %arg3[%c0_21, %c0_22, %c0_23] : memref<8x8x8xf32, #tpu.memory_space<vmem>>, vector<8x8x8xf32>
    %c0_24 = arith.constant 0 : index
    %c0_25 = arith.constant 0 : index
    %c0_26 = arith.constant 0 : index
    %37 = vector.load %arg6[%c0_24, %c0_25, %c0_26] : memref<8x8x8xf32, #tpu.memory_space<vmem>>, vector<8x8x8xf32>
    %cst_27 = arith.constant dense<0.000000e+00> : vector<8x8x8xf32>
    %38 = tpu.matmul %36, %37, %cst_27 {dimension_numbers = #tpu.dot_dimension_numbers<[2], [1], [1], [2], [0, 0, 0, 1, 1, 2], [0], [0]>} : vector<8x8x8xf32>, vector<8x8x8xf32>, vector<8x8x8xf32> -> vector<8x8x8xf32>
    %39 = vector.extract_strided_slice %38 {offsets = [0, 0, 0], sizes = [8, 1, 8], strides = [1, 1, 1]} : vector<8x8x8xf32> to vector<8x1x8xf32>
    %40 = vector.shape_cast %39 : vector<8x1x8xf32> to vector<8x8xf32>
    %c0_28 = arith.constant 0 : index
    %c0_29 = arith.constant 0 : index
    %41 = vector.load %arg7[%c0_28, %c0_29] : memref<16x32xf32, #tpu.memory_space<vmem>>, vector<8x8xf32>
    tpu.vector_store %arg7[%c0_28, %c0_29], %40 {strides = array<i32>} : memref<16x32xf32, #tpu.memory_space<vmem>>, vector<8x8xf32>,
    %42 = vector.extract_strided_slice %38 {offsets = [0, 4, 0], sizes = [8, 1, 8], strides = [1, 1, 1]} : vector<8x8x8xf32> to vector<8x1x8xf32>
    %43 = vector.shape_cast %42 : vector<8x1x8xf32> to vector<8x8xf32>
    %c8 = arith.constant 8 : index
    %c0_30 = arith.constant 0 : index
    %44 = vector.load %arg7[%c8, %c0_30] : memref<16x32xf32, #tpu.memory_space<vmem>>, vector<8x8xf32>
    tpu.vector_store %arg7[%c8, %c0_30], %43 {strides = array<i32>} : memref<16x32xf32, #tpu.memory_space<vmem>>, vector<8x8xf32>,
    %45 = vector.extract_strided_slice %38 {offsets = [0, 1, 0], sizes = [8, 1, 8], strides = [1, 1, 1]} : vector<8x8x8xf32> to vector<8x1x8xf32>
    %46 = vector.shape_cast %45 : vector<8x1x8xf32> to vector<8x8xf32>
    %c0_31 = arith.constant 0 : index
    %c8_32 = arith.constant 8 : index
    %47 = vector.load %arg7[%c0_31, %c8_32] : memref<16x32xf32, #tpu.memory_space<vmem>>, vector<8x8xf32>
    tpu.vector_store %arg7[%c0_31, %c8_32], %46 {strides = array<i32>} : memref<16x32xf32, #tpu.memory_space<vmem>>, vector<8x8xf32>,
    %48 = vector.extract_strided_slice %38 {offsets = [0, 5, 0], sizes = [8, 1, 8], strides = [1, 1, 1]} : vector<8x8x8xf32> to vector<8x1x8xf32>
    %49 = vector.shape_cast %48 : vector<8x1x8xf32> to vector<8x8xf32>
    %c8_33 = arith.constant 8 : index
    %c8_34 = arith.constant 8 : index
    %50 = vector.load %arg7[%c8_33, %c8_34] : memref<16x32xf32, #tpu.memory_space<vmem>>, vector<8x8xf32>
    tpu.vector_store %arg7[%c8_33, %c8_34], %49 {strides = array<i32>} : memref<16x32xf32, #tpu.memory_space<vmem>>, vector<8x8xf32>,
    %51 = vector.extract_strided_slice %38 {offsets = [0, 2, 0], sizes = [8, 1, 8], strides = [1, 1, 1]} : vector<8x8x8xf32> to vector<8x1x8xf32>
    %52 = vector.shape_cast %51 : vector<8x1x8xf32> to vector<8x8xf32>
    %c0_35 = arith.constant 0 : index
    %c16 = arith.constant 16 : index
    %53 = vector.load %arg7[%c0_35, %c16] : memref<16x32xf32, #tpu.memory_space<vmem>>, vector<8x8xf32>
    tpu.vector_store %arg7[%c0_35, %c16], %52 {strides = array<i32>} : memref<16x32xf32, #tpu.memory_space<vmem>>, vector<8x8xf32>,
    %54 = vector.extract_strided_slice %38 {offsets = [0, 6, 0], sizes = [8, 1, 8], strides = [1, 1, 1]} : vector<8x8x8xf32> to vector<8x1x8xf32>
    %55 = vector.shape_cast %54 : vector<8x1x8xf32> to vector<8x8xf32>
    %c8_36 = arith.constant 8 : index
    %c16_37 = arith.constant 16 : index
    %56 = vector.load %arg7[%c8_36, %c16_37] : memref<16x32xf32, #tpu.memory_space<vmem>>, vector<8x8xf32>
    tpu.vector_store %arg7[%c8_36, %c16_37], %55 {strides = array<i32>} : memref<16x32xf32, #tpu.memory_space<vmem>>, vector<8x8xf32>,
    %57 = vector.extract_strided_slice %38 {offsets = [0, 3, 0], sizes = [8, 1, 8], strides = [1, 1, 1]} : vector<8x8x8xf32> to vector<8x1x8xf32>
    %58 = vector.shape_cast %57 : vector<8x1x8xf32> to vector<8x8xf32>
    %c0_38 = arith.constant 0 : index
    %c24 = arith.constant 24 : index
    %59 = vector.load %arg7[%c0_38, %c24] : memref<16x32xf32, #tpu.memory_space<vmem>>, vector<8x8xf32>
    tpu.vector_store %arg7[%c0_38, %c24], %58 {strides = array<i32>} : memref<16x32xf32, #tpu.memory_space<vmem>>, vector<8x8xf32>,
    %60 = vector.extract_strided_slice %38 {offsets = [0, 7, 0], sizes = [8, 1, 8], strides = [1, 1, 1]} : vector<8x8x8xf32> to vector<8x1x8xf32>
    %61 = vector.shape_cast %60 : vector<8x1x8xf32> to vector<8x8xf32>
    %c8_39 = arith.constant 8 : index
    %c24_40 = arith.constant 24 : index
    %62 = vector.load %arg7[%c8_39, %c24_40] : memref<16x32xf32, #tpu.memory_space<vmem>>, vector<8x8xf32>
    tpu.vector_store %arg7[%c8_39, %c24_40], %61 {strides = array<i32>} : memref<16x32xf32, #tpu.memory_space<vmem>>, vector<8x8xf32>,
    %c0_41 = arith.constant 0 : index
    %c0_42 = arith.constant 0 : index
    %63 = vector.load %arg7[%c0_41, %c0_42] : memref<16x32xf32, #tpu.memory_space<vmem>>, vector<16x32xf32>
    %c0_43 = arith.constant 0 : index
    %c0_44 = arith.constant 0 : index
    %64 = vector.load %arg4[%c0_43, %c0_44] : memref<16x16xf32, #tpu.memory_space<vmem>>, vector<16x16xf32>
    %cst_45 = arith.constant dense<0.000000e+00> : vector<32x16xf32>
    %65 = tpu.matmul %63, %64, %cst_45 {dimension_numbers = #tpu.dot_dimension_numbers<[0], [0], [1], [1], [0, 1, 1, 1], [], []>} : vector<16x32xf32>, vector<16x16xf32>, vector<32x16xf32> -> vector<32x16xf32>
    %c0_46 = arith.constant 0 : index
    %c0_47 = arith.constant 0 : index
    %c0_48 = arith.constant 0 : index
    %66 = vector.load %arg5[%c0_46, %c0_47, %c0_48] : memref<1x32x16xf32, #tpu.memory_space<vmem>>, vector<1x32x16xf32>
    %67 = vector.shape_cast %66 : vector<1x32x16xf32> to vector<32x16xf32>
    %68 = vector.shape_cast %65 : vector<32x16xf32> to vector<1x32x16xf32>
    tpu.vector_store %arg5[%c0_46, %c0_47, %c0_48], %68 {strides = array<i32>} : memref<1x32x16xf32, #tpu.memory_space<vmem>>, vector<1x32x16xf32>,
    return
  }
  func.func @transform_0(%arg0: i32) -> (i32, i32, i32) {
    %c0_i32 = arith.constant 0 : i32
    %c0_i32_0 = arith.constant 0 : i32
    %c0_i32_1 = arith.constant 0 : i32
    return %arg0, %c0_i32, %c0_i32_0 : i32, i32, i32
  }
  func.func @transform_1(%arg0: i32) -> (i32, i32) {
    %c0_i32 = arith.constant 0 : i32
    %c0_i32_0 = arith.constant 0 : i32
    %c0_i32_1 = arith.constant 0 : i32
    return %c0_i32, %c0_i32_0 : i32, i32
  }
  func.func @transform_2(%arg0: i32) -> (i32, i32, i32) {
    %c0_i32 = arith.constant 0 : i32
    %c0_i32_0 = arith.constant 0 : i32
    %c0_i32_1 = arith.constant 0 : i32
    %c0_i32_2 = arith.constant 0 : i32
    return %c0_i32, %c0_i32_0, %c0_i32_1 : i32, i32, i32
  }
  func.func @transform_3(%arg0: i32) -> (i32, i32) {
    %c0_i32 = arith.constant 0 : i32
    %c0_i32_0 = arith.constant 0 : i32
    %c0_i32_1 = arith.constant 0 : i32
    return %c0_i32, %c0_i32_0 : i32, i32
  }
  func.func @transform_4(%arg0: i32) -> (i32, i32, i32) {
    %c0_i32 = arith.constant 0 : i32
    %c0_i32_0 = arith.constant 0 : i32
    %c0_i32_1 = arith.constant 0 : i32
    return %arg0, %c0_i32, %c0_i32_0 : i32, i32, i32
  }
}

</mosaic_0001>

<bundles_post_ra>
// kernel: tpu_custom_call.1
= control target key start
LH: loop header
LB: loop body
LE: loop exit
PB: predicated region body
PF: predicated region fallthrough
CT: control target
= control target key end

     0   :  { %9 = vsyncpa [#allocation5], 0  ;;  %s749_s18 = smov [#allocation4]   ;;  %s750_s20 = smov 128   ;;  %s952_s0 = inlined_call_operand.vmem [shape: f32[1,32,16], index: 0, kind: input, shape index: {}]   ;;  %s953_s1 = inlined_call_operand.vmem [shape: f32[16,16], index: 1, kind: input, shape index: {}]   ;;  %s954_s2 = inlined_call_operand.hbm [shape: f32[8,8,8], index: 2, kind: input, shape index: {}]   ;;  %s955_s3 = inlined_call_operand.vmem [shape: f32[16,16], index: 3, kind: input, shape index: {}]   ;;  %s956_s4 = inlined_call_operand.vmem [shape: f32[1,32,16], index: 4, kind: output, shape index: {}]  }
   0x1   :  { %s18_s17 = sshll.u32 %s954_s2, 4  ;;  %s20_s19 = sshll.u32 %s749_s18, 4  ;;  %s19_s17 = int_to_ptr.hbm [resolvable:$true] %s18_s17  ;;  %s21_s19 = int_to_ptr.vmem [resolvable:$true] %s20_s19 }
   0x2   :  { %s751_s21 = smov 8  }
   0x3   :  { %26 = dma.hbm_to_vmem [thread:$0]  %s19_s17, 1024, %s21_s19, [#allocation5], %s750_s20, %s750_s20, %s751_s21  }
   0x4   :  { %747 = dma.done.wait [#allocation5], 1024  }
   0x5   :  { %748 = vsyncadd [#allocation5], 4294966272  ;;  %vm39_vm0 = vcmask 130048   ;;  %v38_v0 = vld [vmem:[%s952_s0 + $0x18] sm:$0xff]  ;;  %v37_v1 = vld [vmem:[%s952_s0 + $0x10] sm:$0xff]  ;;  %s752_s7 = smov 120  }
   0x6   :  { %688 = vmatpush.xpose.msk.msra.mxu0 %vm39_vm0, %v38_v0  ;;  %v36_v2 = vld [vmem:[%s952_s0 + $0x8] sm:$0xff]  ;;  %v35_v3 = vld [vmem:[%s952_s0] sm:$0xff]  ;;  %s753_s8 = smov 104   ;;  %s754_s0 = smov 112   ;;  %v755_v9 = vmov 1983009808  }
   0x7   :  { %v33_v4 = vld [vmem:[%s953_s1] sm:$0xff]  ;;  %v34_v5 = vld [vmem:[%s953_s1 + $0x8] sm:$0xff]  ;;  %v97_v10 = vunpack.c.l.s4 %v755_v9  ;;  %vm92_vm1 = vcmask 1047556   ;;  %v756_v24 = vmov 1934713408   ;;  %vm148_vm2 = vcmask 60416  }
   0x8   :  { %v121_v25 = vunpack.c.l.s4 %v756_v24  ;;  %vm247_vm3 = vcmask 64512   ;;  %s757_s1 = smov 24   ;;  %s758_s9 = smov 16   ;;  %vm502_vm4 = vcmask 195584   ;;  %vm504_vm5 = vcmask 261120  }
   0x9   :  { %v812_v16 = vunpack.c.0.s8 %v97_v10 }
   0xa   :  { %689 = vmatpush.xpose.msk.msra.mxu0 %vm39_vm0, %v37_v1  ;;  %v822_v33 = vunpack.c.0.s8 %v121_v25 }
   0xe   :  { %690 = vmatpush.xpose.msk.msra.mxu0 %vm39_vm0, %v36_v2 }
  0x12   :  { %691 = vmatpush.xpose.msk.msra.mxu0 %vm39_vm0, %v35_v3 }
  0x15   :  { %692 = vmatmul.msk.f32.vlgmr.msra.gmra.mxu0 %vm39_vm0, %v33_v4 }
  0x1d   :  { %693 = vmatmul.msk.f32.gmra.mxu0 %vm39_vm0, %v34_v5 }
  0x92   :  { %v75_v6 = vpop.f32.mrf.mxu0 }
  0x93   :  { %82 = vrot.lane.b32.xlu1 %v75_v6, %s752_s7  ;;  %88 = vrot.lane.b32.xlu0 %v75_v6, %s753_s8  ;;  %v94_v29 = vrot.slane %v75_v6, 4 }
  0x9a   :  { %v78_v7 = vpop.f32.mrf.mxu0 }
  0x9b   :  { %85 = vrot.lane.b32.xlu1 %v75_v6, %s754_s0  ;;  %158 = vrot.lane.b32.xlu2 %v78_v7, %s752_s7  ;;  %v169_v12 = vrot.slane %v78_v7, 4 }
  0x9c   :  { %164 = vrot.lane.b32.xlu0 %v78_v7, %s753_s8 }
  0xa3   :  { %161 = vrot.lane.b32.xlu2 %v78_v7, %s754_s0 }
  0xf5   :  { %v159_v8 = vpop.permute.xlu2 %158 }
  0xf6   :  { %v181_v30 = vrot.slane %v159_v8, 4 }
  0xfd   :  { %v162_v11 = vpop.permute.xlu2 %161 }
  0xfe   :  { %v167_v13 = vrot.slane %v162_v11, 4  ;;  %v170_v19 = vsel %vm92_vm1, %v162_v11, %v169_v12 }
  0xff   :  { %v178_v23 = vperm.slane %v170_v19, %v812_v16 }
 0x100   :  { %v168_v21 = vsel %vm92_vm1, %v167_v13, %v78_v7 }
 0x101   :  { %v174_v27 = vperm.slane %v168_v21, %v812_v16  ;;  %v205_v32 = vrot.slane %v178_v23, 4  ;;  %v231_v21 = vld [vmem:[#allocation4] sm:$0xff] }
 0x103   :  { %v193_v41 = vrot.slane %v174_v27, 4 }
 0x105   :  { %v83_v14 = vpop.permute.xlu1 %82  ;;  %v89_v15 = vpop.permute.xlu0 %88 }
 0x106   :  { %v106_v17 = vrot.slane %v83_v14, 4  ;;  %v104_v18 = vrot.slane %v89_v15, 4 }
 0x108   :  { %v107_v20 = vsel %vm92_vm1, %v89_v15, %v106_v17  ;;  %v105_v22 = vsel %vm92_vm1, %v104_v18, %v83_v14 }
 0x109   :  { %v115_v26 = vperm.slane %v107_v20, %v812_v16  ;;  %v111_v28 = vperm.slane %v105_v22, %v812_v16 }
 0x10b   :  { %v128_v37 = vrot.slane %v115_v26, 4  ;;  %v116_v42 = vrot.slane %v111_v28, 4 }
 0x10d   :  { %v86_v31 = vpop.permute.xlu1 %85 }
 0x10e   :  { %v91_v34 = vrot.slane %v86_v31, 4  ;;  %v95_v35 = vsel %vm92_vm1, %v86_v31, %v94_v29  ;;  %v165_v36 = vpop.permute.xlu0 %164  ;;  %v233_v31 = vld [vmem:[#allocation4 + $0x10] sm:$0xff] }
 0x10f   :  { %v103_v38 = vperm.slane %v95_v35, %v812_v16  ;;  %v179_v39 = vrot.slane %v165_v36, 4  ;;  %v182_v40 = vsel %vm92_vm1, %v165_v36, %v181_v30  ;;  %v234_v35 = vld [vmem:[#allocation4 + $0x18] sm:$0xff] }
 0x110   :  { %v93_v43 = vsel %vm92_vm1, %v91_v34, %v75_v6  ;;  %v190_v44 = vperm.slane %v182_v40, %v812_v16  ;;  %v238_v36 = vld [vmem:[#allocation4 + $0x38] sm:$0xff] }
 0x111   :  { %v99_v45 = vperm.slane %v93_v43, %v812_v16  ;;  %v129_v46 = vsel %vm92_vm1, %v128_v37, %v103_v38  ;;  %v130_v47 = vrot.slane %v103_v38, 4  ;;  %v180_v48 = vsel %vm92_vm1, %v179_v39, %v159_v8  ;;  %v237_v37 = vld [vmem:[#allocation4 + $0x30] sm:$0xff] }
 0x112   :  { %v135_v49 = vperm.slane %v129_v46, %v822_v33  ;;  %v186_v50 = vperm.slane %v180_v48, %v812_v16  ;;  %v203_v51 = vrot.slane %v190_v44, 4  ;;  %v206_v52 = vsel %vm92_vm1, %v190_v44, %v205_v32  ;;  %v235_v32 = vld [vmem:[#allocation4 + $0x20] sm:$0xff] }
 0x113   :  { %v117_v53 = vsel %vm92_vm1, %v116_v42, %v99_v45  ;;  %v118_v54 = vrot.slane %v99_v45, 4  ;;  %v131_v55 = vsel %vm92_vm1, %v115_v26, %v130_v47  ;;  %v214_v56 = vperm.slane %v206_v52, %v822_v33 }
 0x114   :  { %v123_v57 = vperm.slane %v117_v53, %v822_v33  ;;  %v139_v58 = vperm.slane %v131_v55, %v822_v33  ;;  %v144_v59 = vrot.slane %v135_v49, 4  ;;  %153 = vst.msk [vmem:[#allocation2 + $0x20] sm:$0xf] %vm148_vm2, %v135_v49  ;;  %v191_v60 = vrot.slane %v186_v50, 4 }
 0x115   :  { %v119_v61 = vsel %vm92_vm1, %v111_v28, %v118_v54  ;;  %v194_v62 = vsel %vm92_vm1, %v186_v50, %v193_v41  ;;  %v204_v63 = vsel %vm92_vm1, %v203_v51, %v178_v23  ;;  %229 = vst.msk [vmem:[#allocation2 + $0x34] sm:$0xf] %vm148_vm2, %v214_v56  ;;  %v221_v17 = vrot.slane %v214_v56, 4  ;;  %v232_v23 = vld [vmem:[#allocation4 + $0x8] sm:$0xff] }
 0x116   :  { %v127_v0 = vperm.slane %v119_v61, %v822_v33  ;;  %v140_v1 = vrot.slane %v123_v57, 4  ;;  %v145_v2 = vsel %vm92_vm1, 0.0, %v144_v59  ;;  %v146_v3 = vrot.slane %v139_v58, 4  ;;  %149 = vst.msk [vmem:[#allocation2] sm:$0xf] %vm148_vm2, %v123_v57  ;;  %v236_v28 = vld [vmem:[#allocation4 + $0x28] sm:$0xff] }
 0x117   :  { %154 = vst.msk [vmem:[#allocation2 + $0x28] sm:$0xf] %vm148_vm2, %v145_v2  ;;  %v192_v4 = vsel %vm92_vm1, %v191_v60, %v174_v27  ;;  %v202_v5 = vperm.slane %v194_v62, %v822_v33  ;;  %v210_v6 = vperm.slane %v204_v63, %v822_v33  ;;  %v222_v20 = vsel %vm92_vm1, 0.0, %v221_v17 }
 0x118   :  { %v141_v7 = vsel %vm92_vm1, 0.0, %v140_v1  ;;  %v142_v8 = vrot.slane %v127_v0, 4  ;;  %151 = vst.msk [vmem:[#allocation2 + $0x10] sm:$0xf] %vm148_vm2, %v127_v0  ;;  %v198_v9 = vperm.slane %v192_v4, %v822_v33  ;;  %v147_v10 = vsel %vm92_vm1, 0.0, %v146_v3 }
 0x119   :  { %150 = vst.msk [vmem:[#allocation2 + $0x8] sm:$0xf] %vm148_vm2, %v141_v7  ;;  %v217_v11 = vrot.slane %v202_v5, 4  ;;  %v219_v14 = vrot.slane %v210_v6, 4 }
 0x11a   :  { %v143_v12 = vsel %vm92_vm1, 0.0, %v142_v8  ;;  %155 = vst.msk [vmem:[#allocation2 + $0x30] sm:$0xf] %vm148_vm2, %v139_v58  ;;  %v215_v13 = vrot.slane %v198_v9, 4 }
 0x11b   :  { %152 = vst.msk [vmem:[#allocation2 + $0x18] sm:$0xf] %vm148_vm2, %v143_v12  ;;  %v218_v18 = vsel %vm92_vm1, 0.0, %v217_v11  ;;  %v220_v19 = vsel %vm92_vm1, 0.0, %v219_v14 }
 0x11c   :  { %156 = vst.msk [vmem:[#allocation2 + $0x38] sm:$0xf] %vm148_vm2, %v147_v10  ;;  %v216_v15 = vsel %vm92_vm1, 0.0, %v215_v13 }
 0x11d   :  { %223 = vst.msk [vmem:[#allocation2 + $0x4] sm:$0xf] %vm148_vm2, %v198_v9 }
 0x11e   :  { %224 = vst.msk [vmem:[#allocation2 + $0xc] sm:$0xf] %vm148_vm2, %v216_v15 }
 0x11f   :  { %225 = vst.msk [vmem:[#allocation2 + $0x14] sm:$0xf] %vm148_vm2, %v202_v5 }
 0x120   :  { %226 = vst.msk [vmem:[#allocation2 + $0x1c] sm:$0xf] %vm148_vm2, %v218_v18 }
 0x121   :  { %227 = vst.msk [vmem:[#allocation2 + $0x24] sm:$0xf] %vm148_vm2, %v210_v6  ;;  %v245_v34 = vld [vmem:[#allocation2 + $0x30] sm:$0xff] }
 0x122   :  { %228 = vst.msk [vmem:[#allocation2 + $0x2c] sm:$0xf] %vm148_vm2, %v220_v19 }
 0x123   :  { %230 = vst.msk [vmem:[#allocation2 + $0x3c] sm:$0xf] %vm148_vm2, %v222_v20 }
 0x124   :  { %v239_v22 = vld [vmem:[#allocation2] sm:$0xff] }
 0x125   :  { %266 = vmatpush.msra.mxu1 %v239_v22  ;;  %v240_v24 = vld [vmem:[#allocation2 + $0x8] sm:$0xff] }
 0x126   :  { %694 = vmatmul.msk.f32.vlgmr.msra.gmra.mxu1 %vm247_vm3, %v231_v21  ;;  %v241_v25 = vld [vmem:[#allocation2 + $0x10] sm:$0xff]  ;;  %289 = vmatpush.msra.mxu2 %v240_v24 }
 0x127   :  { %312 = vmatpush.msrb.mxu1 %v241_v25  ;;  %v242_v26 = vld [vmem:[#allocation2 + $0x18] sm:$0xff]  ;;  %695 = vmatmul.msk.f32.vlgmr.msra.gmra.mxu2 %vm247_vm3, %v232_v23 }
 0x128   :  { %v243_v27 = vld [vmem:[#allocation2 + $0x20] sm:$0xff] }
 0x129   :  { %335 = vmatpush.msra.mxu1 %v242_v26  ;;  %v244_v29 = vld [vmem:[#allocation2 + $0x28] sm:$0xff]  ;;  %358 = vmatpush.msrb.mxu2 %v243_v27 }
 0x12a   :  { %381 = vmatpush.msra.mxu3 %v244_v29  ;;  %v246_v30 = vld [vmem:[#allocation2 + $0x38] sm:$0xff] }
 0x12b   :  { %427 = vmatpush.msra.mxu2 %v246_v30  ;;  %699 = vmatmul.msk.f32.vlgmr.msra.gmra.mxu3 %vm247_vm3, %v236_v28 }
 0x12e   :  { %696 = vmatmul.msk.f32.vlgmr.msrb.gmra.mxu1 %vm247_vm3, %v233_v31 }
 0x12f   :  { %404 = vmatpush.msrb.mxu1 %v245_v34  ;;  %698 = vmatmul.msk.f32.vlgmr.msrb.gmra.mxu2 %vm247_vm3, %v235_v32 }
 0x136   :  { %697 = vmatmul.msk.f32.vlgmr.msra.gmra.mxu1 %vm247_vm3, %v234_v35 }
 0x137   :  { %701 = vmatmul.msk.f32.vlgmr.msra.gmra.mxu2 %vm247_vm3, %v238_v36 }
 0x13e   :  { %700 = vmatmul.msk.f32.vlgmr.msrb.gmra.mxu1 %vm247_vm3, %v237_v37 }
 0x1a3   :  { %v268_v38 = vpop.f32.mrf.mxu1 }
 0x1a4   :  { %v514_v54 = vrot.slane %v268_v38, 4 }
 0x1aa   :  { %v291_v39 = vpop.f32.mrf.mxu2 }
 0x1ab   :  { %v314_v40 = vpop.f32.mrf.mxu1  ;;  %v515_v42 = vrot.slane %v291_v39, 4 }
 0x1ac   :  { %v432_v41 = vrot.slane %v314_v40, 4  ;;  %v531_v56 = vsel %vm92_vm1, %v314_v40, %v514_v54 }
 0x1ad   :  { %v535_v4 = vperm.slane %v531_v56, %v812_v16 }
 0x1ae   :  { %v433_v45 = vsel %vm92_vm1, %v432_v41, %v268_v38  ;;  %v383_v48 = vpop.f32.mrf.mxu3 }
 0x1af   :  { %v437_v50 = vperm.slane %v433_v45, %v812_v16  ;;  %v519_v53 = vrot.slane %v383_v48, 4  ;;  %v556_v21 = vrot.slane %v535_v4, 4 }
 0x1b1   :  { %v458_v59 = vrot.slane %v437_v50, 4 }
 0x1b2   :  { %v360_v43 = vpop.f32.mrf.mxu2 }
 0x1b3   :  { %v337_v44 = vpop.f32.mrf.mxu1  ;;  %v518_v57 = vrot.slane %v360_v43, 4 }
 0x1b4   :  { %v438_v46 = vrot.slane %v337_v44, 4  ;;  %v537_v47 = vsel %vm92_vm1, %v337_v44, %v515_v42 }
 0x1b5   :  { %v541_v52 = vperm.slane %v537_v47, %v812_v16  ;;  %v605_v47 = vld [vmem:[%s955_s3 + $0x8] sm:$0xff] }
 0x1b6   :  { %v439_v49 = vsel %vm92_vm1, %v438_v46, %v291_v39  ;;  %664 = vmatpush.msrb.mxu2 %v605_v47  ;;  %710 = vmatpush.msrb.mxu3 %v605_v47 }
 0x1b7   :  { %v443_v51 = vperm.slane %v439_v49, %v812_v16  ;;  %v554_v60 = vrot.slane %v541_v52, 4  ;;  %v557_v27 = vsel %vm92_vm1, %v541_v52, %v556_v21 }
 0x1b8   :  { %v565_v39 = vperm.slane %v557_v27, %v822_v33 }
 0x1b9   :  { %v456_v55 = vrot.slane %v443_v51, 4  ;;  %v459_v7 = vsel %vm92_vm1, %v443_v51, %v458_v59  ;;  %v555_v13 = vsel %vm92_vm1, %v554_v60, %v535_v4 }
 0x1ba   :  { %v429_v58 = vpop.f32.mrf.mxu2  ;;  %v467_v15 = vperm.slane %v459_v7, %v822_v33  ;;  %v561_v23 = vperm.slane %v555_v13, %v822_v33  ;;  %v584_v42 = vrot.slane %v565_v39, 4 }
 0x1bb   :  { %v406_v61 = vpop.f32.mrf.mxu1  ;;  %v450_v62 = vrot.slane %v429_v58, 4  ;;  %v549_v63 = vsel %vm92_vm1, %v429_v58, %v519_v53  ;;  %v457_v3 = vsel %vm92_vm1, %v456_v55, %v437_v50 }
 0x1bc   :  { %v444_v0 = vrot.slane %v406_v61, 4  ;;  %v543_v1 = vsel %vm92_vm1, %v406_v61, %v518_v57  ;;  %v553_v2 = vperm.slane %v549_v63, %v812_v16  ;;  %v463_v12 = vperm.slane %v457_v3, %v822_v33 }
 0x1bd   :  { %v547_v5 = vperm.slane %v543_v1, %v812_v16  ;;  %v451_v6 = vsel %vm92_vm1, %v450_v62, %v383_v48  ;;  %v486_v29 = vrot.slane %v467_v15, 4  ;;  %v580_v41 = vrot.slane %v561_v23, 4 }
 0x1be   :  { %v445_v8 = vsel %vm92_vm1, %v444_v0, %v360_v43  ;;  %v455_v9 = vperm.slane %v451_v6, %v812_v16  ;;  %v566_v10 = vrot.slane %v553_v2, 4  ;;  %v482_v25 = vrot.slane %v463_v12, 4 }
 0x1bf   :  { %v449_v11 = vperm.slane %v445_v8, %v812_v16  ;;  %v568_v19 = vrot.slane %v547_v5, 4 }
 0x1c0   :  { %v468_v14 = vrot.slane %v455_v9, 4  ;;  %v567_v17 = vsel %vm92_vm1, %v566_v10, %v547_v5 }
 0x1c1   :  { %v470_v18 = vrot.slane %v449_v11, 4  ;;  %v573_v20 = vperm.slane %v567_v17, %v822_v33  ;;  %v569_v32 = vsel %vm92_vm1, %v553_v2, %v568_v19 }
 0x1c2   :  { %v469_v22 = vsel %vm92_vm1, %v468_v14, %v449_v11  ;;  %v577_v40 = vperm.slane %v569_v32, %v822_v33 }
 0x1c3   :  { %v471_v16 = vsel %vm92_vm1, %v455_v9, %v470_v18  ;;  %v475_v24 = vperm.slane %v469_v22, %v822_v33  ;;  %v578_v26 = vrot.slane %v573_v20, 4  ;;  %v581_v44 = vsel %vm92_vm1, %v573_v20, %v580_v41 }
 0x1c4   :  { %v479_v28 = vperm.slane %v471_v16, %v822_v33  ;;  %v582_v43 = vrot.slane %v577_v40, 4  ;;  %v585_v45 = vsel %vm92_vm1, %v577_v40, %v584_v42  ;;  %v604_v33 = vld [vmem:[%s955_s3] sm:$0xff] }
 0x1c5   :  { %v483_v30 = vsel %vm92_vm1, %v475_v24, %v482_v25  ;;  %v480_v31 = vrot.slane %v475_v24, 4  ;;  %v579_v34 = vsel %vm92_vm1, %v578_v26, %v561_v23  ;;  %665 = vmatpush.msrb.mxu2 %v604_v33  ;;  %711 = vmatpush.msrb.mxu3 %v604_v33 }
 0x1c6   :  { %v487_v35 = vsel %vm92_vm1, %v479_v28, %v486_v29  ;;  %489 = vrot.lane.b32.xlu0 %v483_v30, %s751_s21  ;;  %v484_v36 = vrot.slane %v479_v28, 4  ;;  %v583_v46 = vsel %vm92_vm1, %v582_v43, %v565_v39 }
 0x1c7   :  { %497 = vrot.lane.b32.xlu2 %v487_v35, %s757_s1  ;;  %v481_v37 = vsel %vm92_vm1, %v480_v31, %v463_v12 }
 0x1c8   :  { %v485_v38 = vsel %vm92_vm1, %v484_v36, %v467_v15 }
 0x1c9   :  { %493 = vrot.lane.b32.xlu1 %v485_v38, %s758_s9 }
 0x1ce   :  { %587 = vrot.lane.b32.xlu0 %v581_v44, %s751_s21 }
 0x1cf   :  { %595 = vrot.lane.b32.xlu2 %v585_v45, %s757_s1 }
 0x1d1   :  { %591 = vrot.lane.b32.xlu1 %v583_v46, %s758_s9 }
 0x221   :  { %v498_v50 = vpop.permute.xlu2 %497 }
 0x229   :  { %v596_v57 = vpop.permute.xlu2 %595 }
 0x238   :  { %v490_v48 = vpop.permute.xlu0 %489 }
 0x239   :  { %v500_v49 = vsel %vm247_vm3, %v481_v37, %v490_v48 }
 0x23b   :  { %v494_v51 = vpop.permute.xlu1 %493 }
 0x23c   :  { %v501_v52 = vsel %vm39_vm0, %v500_v49, %v494_v51 }
 0x23d   :  { %v503_v53 = vsel %vm502_vm4, %v501_v52, %v498_v50 }
 0x23e   :  { %505 = vst.msk [vmem:[#allocation3] sm:$0xff] %vm504_vm5, %v503_v53 }
 0x240   :  { %v588_v54 = vpop.permute.xlu0 %587 }
 0x241   :  { %v598_v55 = vsel %vm247_vm3, %v579_v34, %v588_v54 }
 0x243   :  { %v592_v56 = vpop.permute.xlu1 %591 }
 0x244   :  { %v599_v58 = vsel %vm39_vm0, %v598_v55, %v592_v56 }
 0x245   :  { %v600_v59 = vsel %vm502_vm4, %v599_v58, %v596_v57  ;;  %v602_v60 = vld [vmem:[#allocation3] sm:$0xff] }
 0x246   :  { %601 = vst.msk [vmem:[#allocation3 + $0x8] sm:$0xff] %vm504_vm5, %v600_v59  ;;  %606 = vxpose.xlu0.b32.start [1/2] (short) (narrow) %v602_v60, 32 }
 0x24d   :  { %v603_v61 = vld [vmem:[#allocation3 + $0x8] sm:$0xff] }
 0x24e   :  { %607 = vxpose.xlu0.b32.end [2/2] (short) (narrow) %v603_v61, 32 }
 0x2ea   :  { %v622_v62 = vpop.trf.xlu0 }
 0x2eb   :  { %706 = vmatmul.msk.f32.vlgmr.msrb.gmra.mxu2 %vm39_vm0, %v622_v62 }
 0x2f2   :  { %v623_v63 = vpop.trf.xlu0 }
 0x2f3   :  { %707 = vmatmul.msk.f32.vlgmr.msrb.gmra.mxu3 %vm39_vm0, %v623_v63 }
 0x2fa   :  { %v624_v0 = vpop.trf.xlu0 }
 0x2fb   :  { %708 = vmatmul.msk.f32.gmra.mxu3 %vm39_vm0, %v624_v0 }
 0x302   :  { %v625_v1 = vpop.trf.xlu0 }
 0x303   :  { %709 = vmatmul.msk.f32.gmra.mxu3 %vm39_vm0, %v625_v1 }
 0x36e   :  { %v667_v2 = vpop.f32.mrf.mxu2 }
 0x36f   :  { %679 = vst.msk [vmem:[%s956_s4] sm:$0xff] %vm39_vm0, %v667_v2 }
 0x376   :  { %v670_v3 = vpop.f32.mrf.mxu3 }
 0x377   :  { %680 = vst.msk [vmem:[%s956_s4 + $0x8] sm:$0xff] %vm39_vm0, %v670_v3 }
 0x37e   :  { %v673_v4 = vpop.f32.mrf.mxu3 }
 0x37f   :  { %681 = vst.msk [vmem:[%s956_s4 + $0x10] sm:$0xff] %vm39_vm0, %v673_v4 }
 0x386   :  { %v676_v5 = vpop.f32.mrf.mxu3 }
 0x387   :  { %682 = vst.msk [vmem:[%s956_s4 + $0x18] sm:$0xff] %vm39_vm0, %v676_v5 }
 0x388   :  { %687 = vsyncpa [#allocation5], 1 }

// kernel: tpu_custom_call.1
= control target key start
LH: loop header
LB: loop body
LE: loop exit
PB: predicated region body
PF: predicated region fallthrough
CT: control target
= control target key end

     0   :  { %9 = vsyncpa [#allocation5], 0  ;;  %s817_s18 = smov [#allocation4]   ;;  %s818_s20 = smov 128   ;;  %s1138_s0 = inlined_call_operand.vmem [shape: f32[1,32,16], index: 0, kind: input, shape index: {}]   ;;  %s1139_s1 = inlined_call_operand.vmem [shape: f32[16,16], index: 1, kind: input, shape index: {}]   ;;  %s1140_s2 = inlined_call_operand.hbm [shape: f32[8,8,8], index: 2, kind: input, shape index: {}]   ;;  %s1141_s3 = inlined_call_operand.vmem [shape: f32[16,16], index: 3, kind: input, shape index: {}]   ;;  %s1142_s4 = inlined_call_operand.vmem [shape: f32[1,32,16], index: 4, kind: output, shape index: {}]  }
   0x1   :  { %s18_s17 = sshll.u32 %s1140_s2, 4  ;;  %s20_s19 = sshll.u32 %s817_s18, 4  ;;  %s19_s17 = int_to_ptr.hbm [resolvable:$true] %s18_s17  ;;  %s21_s19 = int_to_ptr.vmem [resolvable:$true] %s20_s19 }
   0x2   :  { %s819_s21 = smov 8  }
   0x3   :  { %26 = dma.hbm_to_vmem [thread:$0]  %s19_s17, 1024, %s21_s19, [#allocation5], %s818_s20, %s818_s20, %s819_s21  }
   0x4   :  { %815 = dma.done.wait [#allocation5], 1024  }
   0x5   :  { %816 = vsyncadd [#allocation5], 4294966272  ;;  %vm39_vm0 = vcmask 130048   ;;  %v38_v0 = vld [vmem:[%s1138_s0 + $0x18] sm:$0xff]  ;;  %v37_v1 = vld [vmem:[%s1138_s0 + $0x10] sm:$0xff]  ;;  %vm96_vm1 = vcmask 57344  }
   0x6   :  { %762 = vmatpush.xpose.msk.msra.mxu0 %vm39_vm0, %v38_v0  ;;  %v36_v2 = vld [vmem:[%s1138_s0 + $0x8] sm:$0xff]  ;;  %v35_v3 = vld [vmem:[%s1138_s0] sm:$0xff]  ;;  %s820_s0 = smov 104   ;;  %s822_s7 = smov 120   ;;  %vm352_vm2 = vcmask 64512   ;;  %vm561_vm3 = vcmask 1046534  }
   0x7   :  { %v33_v4 = vld [vmem:[%s1139_s1] sm:$0xff]  ;;  %v34_v5 = vld [vmem:[%s1139_s1 + $0x8] sm:$0xff]  ;;  %s821_s1 = smov 112   ;;  %vm564_vm4 = vcmask 1047559   ;;  %s823_s8 = smov 16   ;;  %vm555_vm5 = vcmask 1044484  }
   0x8   :  { %vm558_vm6 = vcmask 1045509   ;;  %vm576_vm7 = vcmask 64516   ;;  %vm552_vm8 = vcmask 1043459   ;;  %s824_s9 = smov 24   ;;  %vm549_vm9 = vcmask 1042434  }
   0x9   :  { %vm546_vm10 = vcmask 1041409   ;;  %vm578_vm11 = vcmask 60416   ;;  %vm608_vm12 = vcmask 130117   ;;  %vm640_vm13 = vcmask 195718  }
   0xa   :  { %763 = vmatpush.xpose.msk.msra.mxu0 %vm39_vm0, %v37_v1  ;;  %vm594_vm14 = vcmask 122944   ;;  %vm592_vm15 = vcmask 130113  }
   0xe   :  { %764 = vmatpush.xpose.msk.msra.mxu0 %vm39_vm0, %v36_v2 }
  0x12   :  { %765 = vmatpush.xpose.msk.msra.mxu0 %vm39_vm0, %v35_v3 }
  0x15   :  { %766 = vmatmul.msk.f32.vlgmr.msra.gmra.mxu0 %vm39_vm0, %v33_v4 }
  0x1d   :  { %767 = vmatmul.msk.f32.gmra.mxu0 %vm39_vm0, %v34_v5 }
  0x92   :  { %v878_v6 = vpop.f32.mrf.mxu0 }
  0x93   :  { %97 = vst.msk [vmem:[#allocation2] sm:$0x1] %vm96_vm1, %v878_v6  ;;  %v128_v7 = vperm.slane %v878_v6, 0  ;;  %v82_v8 = vrot.slane %v878_v6, 1  ;;  %v83_v9 = vrot.slane %v878_v6, 2  ;;  %v85_v10 = vrot.slane %v878_v6, 4 }
  0x94   :  { %v84_v11 = vrot.slane %v878_v6, 3  ;;  %v86_v12 = vrot.slane %v878_v6, 5  ;;  %v88_v13 = vrot.slane %v878_v6, 7  ;;  %v87_v14 = vrot.slane %v878_v6, 6  ;;  %v336_v6 = vld [vmem:[#allocation4] sm:$0xff] }
  0x95   :  { %272 = vrot.lane.b32.xlu2 %v128_v7, %s820_s0  ;;  %208 = vrot.lane.b32.xlu1 %v128_v7, %s821_s1  ;;  %98 = vst.msk [vmem:[#allocation2 + $0x8] sm:$0x1] %vm96_vm1, %v82_v8  ;;  %v129_v15 = vperm.slane %v82_v8, 0  ;;  %v130_v16 = vperm.slane %v83_v9, 0  ;;  %v132_v18 = vperm.slane %v85_v10, 0 }
  0x96   :  { %136 = vrot.lane.b32.xlu0 %v128_v7, %s822_s7  ;;  %99 = vst.msk [vmem:[#allocation2 + $0x10] sm:$0x1] %vm96_vm1, %v83_v9  ;;  %v131_v23 = vperm.slane %v84_v11, 0  ;;  %v133_v27 = vperm.slane %v86_v12, 0  ;;  %v135_v28 = vperm.slane %v88_v13, 0  ;;  %v134_v30 = vperm.slane %v87_v14, 0 }
  0x97   :  { %101 = vst.msk [vmem:[#allocation2 + $0x20] sm:$0x1] %vm96_vm1, %v85_v10 }
  0x98   :  { %100 = vst.msk [vmem:[#allocation2 + $0x18] sm:$0x1] %vm96_vm1, %v84_v11  ;;  %v337_v11 = vld [vmem:[#allocation4 + $0x8] sm:$0xff] }
  0x99   :  { %102 = vst.msk [vmem:[#allocation2 + $0x28] sm:$0x1] %vm96_vm1, %v86_v12 }
  0x9a   :  { %104 = vst.msk [vmem:[#allocation2 + $0x38] sm:$0x1] %vm96_vm1, %v88_v13  ;;  %v906_v17 = vpop.f32.mrf.mxu0 }
  0x9b   :  { %103 = vst.msk [vmem:[#allocation2 + $0x30] sm:$0x1] %vm96_vm1, %v87_v14  ;;  %v106_v19 = vrot.slane %v906_v17, 1  ;;  %v107_v20 = vrot.slane %v906_v17, 2  ;;  %v109_v21 = vrot.slane %v906_v17, 4  ;;  %v108_v22 = vrot.slane %v906_v17, 3 }
  0x9c   :  { %120 = vst.msk [vmem:[#allocation2 + $0x4] sm:$0x1] %vm96_vm1, %v906_v17  ;;  %v110_v24 = vrot.slane %v906_v17, 5  ;;  %v112_v25 = vrot.slane %v906_v17, 7  ;;  %v111_v26 = vrot.slane %v906_v17, 6  ;;  %v168_v29 = vperm.slane %v906_v17, 0 }
  0x9d   :  { %274 = vrot.lane.b32.xlu1 %v129_v15, %s820_s0  ;;  %210 = vrot.lane.b32.xlu2 %v129_v15, %s821_s1  ;;  %121 = vst.msk [vmem:[#allocation2 + $0xc] sm:$0x1] %vm96_vm1, %v106_v19  ;;  %v169_v31 = vperm.slane %v106_v19, 0  ;;  %v170_v32 = vperm.slane %v107_v20, 0  ;;  %v172_v33 = vperm.slane %v109_v21, 0  ;;  %v171_v34 = vperm.slane %v108_v22, 0 }
  0x9e   :  { %138 = vrot.lane.b32.xlu0 %v129_v15, %s822_s7  ;;  %122 = vst.msk [vmem:[#allocation2 + $0x14] sm:$0x1] %vm96_vm1, %v107_v20  ;;  %v173_v36 = vperm.slane %v110_v24, 0  ;;  %v175_v38 = vperm.slane %v112_v25, 0  ;;  %v174_v40 = vperm.slane %v111_v26, 0 }
  0x9f   :  { %124 = vst.msk [vmem:[#allocation2 + $0x24] sm:$0x1] %vm96_vm1, %v109_v21  ;;  %v340_v21 = vld [vmem:[#allocation4 + $0x20] sm:$0xff] }
  0xa0   :  { %123 = vst.msk [vmem:[#allocation2 + $0x1c] sm:$0x1] %vm96_vm1, %v108_v22 }
  0xa1   :  { %125 = vst.msk [vmem:[#allocation2 + $0x2c] sm:$0x1] %vm96_vm1, %v110_v24 }
  0xa2   :  { %127 = vst.msk [vmem:[#allocation2 + $0x3c] sm:$0x1] %vm96_vm1, %v112_v25  ;;  %v339_v25 = vld [vmem:[#allocation4 + $0x18] sm:$0xff] }
  0xa3   :  { %126 = vst.msk [vmem:[#allocation2 + $0x34] sm:$0x1] %vm96_vm1, %v111_v26 }
  0xa5   :  { %276 = vrot.lane.b32.xlu1 %v130_v16, %s820_s0  ;;  %212 = vrot.lane.b32.xlu2 %v130_v16, %s821_s1 }
  0xa6   :  { %140 = vrot.lane.b32.xlu0 %v130_v16, %s822_s7  ;;  %v338_v16 = vld [vmem:[#allocation4 + $0x10] sm:$0xff] }
  0xad   :  { %280 = vrot.lane.b32.xlu1 %v132_v18, %s820_s0  ;;  %216 = vrot.lane.b32.xlu2 %v132_v18, %s821_s1 }
  0xae   :  { %144 = vrot.lane.b32.xlu0 %v132_v18, %s822_s7 }
  0xb5   :  { %278 = vrot.lane.b32.xlu1 %v131_v23, %s820_s0  ;;  %214 = vrot.lane.b32.xlu2 %v131_v23, %s821_s1 }
  0xb6   :  { %142 = vrot.lane.b32.xlu0 %v131_v23, %s822_s7 }
  0xbd   :  { %282 = vrot.lane.b32.xlu1 %v133_v27, %s820_s0  ;;  %218 = vrot.lane.b32.xlu2 %v133_v27, %s821_s1 }
  0xbe   :  { %146 = vrot.lane.b32.xlu0 %v133_v27, %s822_s7 }
  0xc5   :  { %286 = vrot.lane.b32.xlu1 %v135_v28, %s820_s0  ;;  %222 = vrot.lane.b32.xlu2 %v135_v28, %s821_s1 }
  0xc6   :  { %150 = vrot.lane.b32.xlu0 %v135_v28, %s822_s7 }
  0xcd   :  { %220 = vrot.lane.b32.xlu2 %v134_v30, %s821_s1  ;;  %240 = vrot.lane.b32.xlu1 %v168_v29, %s821_s1 }
  0xce   :  { %148 = vrot.lane.b32.xlu0 %v134_v30, %s822_s7 }
  0xd5   :  { %304 = vrot.lane.b32.xlu2 %v168_v29, %s820_s0  ;;  %178 = vrot.lane.b32.xlu1 %v169_v31, %s822_s7 }
  0xd6   :  { %176 = vrot.lane.b32.xlu0 %v168_v29, %s822_s7  ;;  %v341_v29 = vld [vmem:[#allocation4 + $0x28] sm:$0xff] }
  0xdd   :  { %306 = vrot.lane.b32.xlu2 %v169_v31, %s820_s0  ;;  %180 = vrot.lane.b32.xlu1 %v170_v32, %s822_s7 }
  0xde   :  { %242 = vrot.lane.b32.xlu0 %v169_v31, %s821_s1 }
  0xe5   :  { %308 = vrot.lane.b32.xlu2 %v170_v32, %s820_s0  ;;  %184 = vrot.lane.b32.xlu1 %v172_v33, %s822_s7 }
  0xe6   :  { %244 = vrot.lane.b32.xlu0 %v170_v32, %s821_s1 }
  0xed   :  { %312 = vrot.lane.b32.xlu2 %v172_v33, %s820_s0  ;;  %182 = vrot.lane.b32.xlu1 %v171_v34, %s822_s7 }
  0xee   :  { %248 = vrot.lane.b32.xlu0 %v172_v33, %s821_s1  ;;  %v343_v33 = vld [vmem:[#allocation4 + $0x38] sm:$0xff] }
  0xef   :  { %v273_v35 = vpop.permute.xlu2 %272 }
  0xf0   :  { %296 = vst.msk [vmem:[#allocation2 + $0x3] sm:$0x1] %vm96_vm1, %v273_v35 }
  0xf5   :  { %310 = vrot.lane.b32.xlu2 %v171_v34, %s820_s0  ;;  %186 = vrot.lane.b32.xlu1 %v173_v36, %s822_s7 }
  0xf6   :  { %246 = vrot.lane.b32.xlu0 %v171_v34, %s821_s1 }
  0xf7   :  { %v211_v37 = vpop.permute.xlu2 %210 }
  0xf8   :  { %233 = vst.msk [vmem:[#allocation2 + $0xa] sm:$0x1] %vm96_vm1, %v211_v37 }
  0xfd   :  { %314 = vrot.lane.b32.xlu2 %v173_v36, %s820_s0  ;;  %190 = vrot.lane.b32.xlu1 %v175_v38, %s822_s7 }
  0xfe   :  { %250 = vrot.lane.b32.xlu0 %v173_v36, %s821_s1  ;;  %v342_v36 = vld [vmem:[#allocation4 + $0x30] sm:$0xff] }
  0xff   :  { %v213_v39 = vpop.permute.xlu2 %212 }
 0x100   :  { %234 = vst.msk [vmem:[#allocation2 + $0x12] sm:$0x1] %vm96_vm1, %v213_v39 }
 0x105   :  { %318 = vrot.lane.b32.xlu2 %v175_v38, %s820_s0  ;;  %188 = vrot.lane.b32.xlu1 %v174_v40, %s822_s7 }
 0x106   :  { %254 = vrot.lane.b32.xlu0 %v175_v38, %s821_s1 }
 0x107   :  { %v209_v41 = vpop.permute.xlu1 %208  ;;  %v217_v42 = vpop.permute.xlu2 %216 }
 0x108   :  { %232 = vst.msk [vmem:[#allocation2 + $0x2] sm:$0x1] %vm96_vm1, %v209_v41  ;;  %v137_v43 = vpop.permute.xlu0 %136 }
 0x109   :  { %160 = vst.msk [vmem:[#allocation2 + $0x1] sm:$0x1] %vm96_vm1, %v137_v43 }
 0x10a   :  { %236 = vst.msk [vmem:[#allocation2 + $0x22] sm:$0x1] %vm96_vm1, %v217_v42 }
 0x10d   :  { %316 = vrot.lane.b32.xlu2 %v174_v40, %s820_s0  ;;  %284 = vrot.lane.b32.xlu1 %v134_v30, %s820_s0 }
 0x10e   :  { %252 = vrot.lane.b32.xlu0 %v174_v40, %s821_s1 }
 0x10f   :  { %v275_v44 = vpop.permute.xlu1 %274  ;;  %v215_v45 = vpop.permute.xlu2 %214 }
 0x110   :  { %297 = vst.msk [vmem:[#allocation2 + $0xb] sm:$0x1] %vm96_vm1, %v275_v44  ;;  %v139_v46 = vpop.permute.xlu0 %138 }
 0x111   :  { %235 = vst.msk [vmem:[#allocation2 + $0x1a] sm:$0x1] %vm96_vm1, %v215_v45 }
 0x112   :  { %161 = vst.msk [vmem:[#allocation2 + $0x9] sm:$0x1] %vm96_vm1, %v139_v46 }
 0x117   :  { %v277_v47 = vpop.permute.xlu1 %276  ;;  %v219_v48 = vpop.permute.xlu2 %218 }
 0x118   :  { %298 = vst.msk [vmem:[#allocation2 + $0x13] sm:$0x1] %vm96_vm1, %v277_v47  ;;  %v141_v49 = vpop.permute.xlu0 %140 }
 0x119   :  { %237 = vst.msk [vmem:[#allocation2 + $0x2a] sm:$0x1] %vm96_vm1, %v219_v48 }
 0x11a   :  { %162 = vst.msk [vmem:[#allocation2 + $0x11] sm:$0x1] %vm96_vm1, %v141_v49 }
 0x11f   :  { %v281_v50 = vpop.permute.xlu1 %280  ;;  %v223_v51 = vpop.permute.xlu2 %222 }
 0x120   :  { %300 = vst.msk [vmem:[#allocation2 + $0x23] sm:$0x1] %vm96_vm1, %v281_v50  ;;  %v145_v52 = vpop.permute.xlu0 %144 }
 0x121   :  { %239 = vst.msk [vmem:[#allocation2 + $0x3a] sm:$0x1] %vm96_vm1, %v223_v51 }
 0x122   :  { %164 = vst.msk [vmem:[#allocation2 + $0x21] sm:$0x1] %vm96_vm1, %v145_v52 }
 0x127   :  { %v279_v53 = vpop.permute.xlu1 %278  ;;  %v221_v54 = vpop.permute.xlu2 %220 }
 0x128   :  { %299 = vst.msk [vmem:[#allocation2 + $0x1b] sm:$0x1] %vm96_vm1, %v279_v53  ;;  %v143_v55 = vpop.permute.xlu0 %142 }
 0x129   :  { %238 = vst.msk [vmem:[#allocation2 + $0x32] sm:$0x1] %vm96_vm1, %v221_v54 }
 0x12a   :  { %163 = vst.msk [vmem:[#allocation2 + $0x19] sm:$0x1] %vm96_vm1, %v143_v55 }
 0x12f   :  { %v283_v56 = vpop.permute.xlu1 %282  ;;  %v305_v57 = vpop.permute.xlu2 %304 }
 0x130   :  { %301 = vst.msk [vmem:[#allocation2 + $0x2b] sm:$0x1] %vm96_vm1, %v283_v56  ;;  %v147_v58 = vpop.permute.xlu0 %146 }
 0x131   :  { %165 = vst.msk [vmem:[#allocation2 + $0x29] sm:$0x1] %vm96_vm1, %v147_v58 }
 0x132   :  { %328 = vst.msk [vmem:[#allocation2 + $0x7] sm:$0x1] %vm96_vm1, %v305_v57 }
 0x137   :  { %v287_v59 = vpop.permute.xlu1 %286  ;;  %v307_v60 = vpop.permute.xlu2 %306 }
 0x138   :  { %303 = vst.msk [vmem:[#allocation2 + $0x3b] sm:$0x1] %vm96_vm1, %v287_v59  ;;  %v151_v61 = vpop.permute.xlu0 %150 }
 0x139   :  { %167 = vst.msk [vmem:[#allocation2 + $0x39] sm:$0x1] %vm96_vm1, %v151_v61 }
 0x13a   :  { %329 = vst.msk [vmem:[#allocation2 + $0xf] sm:$0x1] %vm96_vm1, %v307_v60 }
 0x13f   :  { %v241_v62 = vpop.permute.xlu1 %240  ;;  %v309_v63 = vpop.permute.xlu2 %308 }
 0x140   :  { %v149_v0 = vpop.permute.xlu0 %148  ;;  %264 = vst.msk [vmem:[#allocation2 + $0x6] sm:$0x1] %vm96_vm1, %v241_v62 }
 0x141   :  { %166 = vst.msk [vmem:[#allocation2 + $0x31] sm:$0x1] %vm96_vm1, %v149_v0 }
 0x142   :  { %330 = vst.msk [vmem:[#allocation2 + $0x17] sm:$0x1] %vm96_vm1, %v309_v63 }
 0x147   :  { %v313_v1 = vpop.permute.xlu2 %312  ;;  %v179_v2 = vpop.permute.xlu1 %178 }
 0x148   :  { %v177_v3 = vpop.permute.xlu0 %176  ;;  %332 = vst.msk [vmem:[#allocation2 + $0x27] sm:$0x1] %vm96_vm1, %v313_v1 }
 0x149   :  { %200 = vst.msk [vmem:[#allocation2 + $0x5] sm:$0x1] %vm96_vm1, %v177_v3 }
 0x14a   :  { %201 = vst.msk [vmem:[#allocation2 + $0xd] sm:$0x1] %vm96_vm1, %v179_v2 }
 0x14f   :  { %v311_v4 = vpop.permute.xlu2 %310  ;;  %v181_v5 = vpop.permute.xlu1 %180 }
 0x150   :  { %331 = vst.msk [vmem:[#allocation2 + $0x1f] sm:$0x1] %vm96_vm1, %v311_v4  ;;  %v243_v7 = vpop.permute.xlu0 %242  ;;  %v344_v8 = vld [vmem:[#allocation2] sm:$0xff] }
 0x151   :  { %265 = vst.msk [vmem:[#allocation2 + $0xe] sm:$0x1] %vm96_vm1, %v243_v7  ;;  %371 = vmatpush.msra.mxu1 %v344_v8 }
 0x152   :  { %202 = vst.msk [vmem:[#allocation2 + $0x15] sm:$0x1] %vm96_vm1, %v181_v5  ;;  %768 = vmatmul.msk.f32.vlgmr.msra.gmra.mxu1 %vm352_vm2, %v336_v6 }
 0x157   :  { %v315_v9 = vpop.permute.xlu2 %314  ;;  %v185_v10 = vpop.permute.xlu1 %184 }
 0x158   :  { %333 = vst.msk [vmem:[#allocation2 + $0x2f] sm:$0x1] %vm96_vm1, %v315_v9  ;;  %v245_v12 = vpop.permute.xlu0 %244  ;;  %v345_v13 = vld [vmem:[#allocation2 + $0x8] sm:$0xff] }
 0x159   :  { %266 = vst.msk [vmem:[#allocation2 + $0x16] sm:$0x1] %vm96_vm1, %v245_v12  ;;  %394 = vmatpush.msra.mxu2 %v345_v13 }
 0x15a   :  { %204 = vst.msk [vmem:[#allocation2 + $0x25] sm:$0x1] %vm96_vm1, %v185_v10  ;;  %769 = vmatmul.msk.f32.vlgmr.msra.gmra.mxu2 %vm352_vm2, %v337_v11 }
 0x15f   :  { %v319_v14 = vpop.permute.xlu2 %318  ;;  %v183_v15 = vpop.permute.xlu1 %182 }
 0x160   :  { %335 = vst.msk [vmem:[#allocation2 + $0x3f] sm:$0x1] %vm96_vm1, %v319_v14  ;;  %v249_v17 = vpop.permute.xlu0 %248  ;;  %v346_v18 = vld [vmem:[#allocation2 + $0x10] sm:$0xff] }
 0x161   :  { %268 = vst.msk [vmem:[#allocation2 + $0x26] sm:$0x1] %vm96_vm1, %v249_v17  ;;  %417 = vmatpush.msrb.mxu1 %v346_v18 }
 0x162   :  { %203 = vst.msk [vmem:[#allocation2 + $0x1d] sm:$0x1] %vm96_vm1, %v183_v15  ;;  %770 = vmatmul.msk.f32.vlgmr.msrb.gmra.mxu1 %vm352_vm2, %v338_v16 }
 0x167   :  { %v317_v19 = vpop.permute.xlu2 %316  ;;  %v187_v20 = vpop.permute.xlu1 %186 }
 0x168   :  { %334 = vst.msk [vmem:[#allocation2 + $0x37] sm:$0x1] %vm96_vm1, %v317_v19  ;;  %v247_v22 = vpop.permute.xlu0 %246  ;;  %v348_v23 = vld [vmem:[#allocation2 + $0x20] sm:$0xff] }
 0x169   :  { %267 = vst.msk [vmem:[#allocation2 + $0x1e] sm:$0x1] %vm96_vm1, %v247_v22  ;;  %463 = vmatpush.msrb.mxu2 %v348_v23 }
 0x16a   :  { %205 = vst.msk [vmem:[#allocation2 + $0x2d] sm:$0x1] %vm96_vm1, %v187_v20  ;;  %772 = vmatmul.msk.f32.vlgmr.msrb.gmra.mxu2 %vm352_vm2, %v340_v21 }
 0x16f   :  { %v191_v24 = vpop.permute.xlu1 %190 }
 0x170   :  { %v251_v26 = vpop.permute.xlu0 %250  ;;  %207 = vst.msk [vmem:[#allocation2 + $0x3d] sm:$0x1] %vm96_vm1, %v191_v24  ;;  %v347_v27 = vld [vmem:[#allocation2 + $0x18] sm:$0xff] }
 0x171   :  { %269 = vst.msk [vmem:[#allocation2 + $0x2e] sm:$0x1] %vm96_vm1, %v251_v26  ;;  %440 = vmatpush.msra.mxu1 %v347_v27 }
 0x172   :  { %771 = vmatmul.msk.f32.vlgmr.msra.gmra.mxu1 %vm352_vm2, %v339_v25 }
 0x177   :  { %v189_v28 = vpop.permute.xlu1 %188 }
 0x178   :  { %v255_v30 = vpop.permute.xlu0 %254  ;;  %206 = vst.msk [vmem:[#allocation2 + $0x35] sm:$0x1] %vm96_vm1, %v189_v28  ;;  %v349_v31 = vld [vmem:[#allocation2 + $0x28] sm:$0xff] }
 0x179   :  { %271 = vst.msk [vmem:[#allocation2 + $0x3e] sm:$0x1] %vm96_vm1, %v255_v30  ;;  %486 = vmatpush.msra.mxu3 %v349_v31 }
 0x17a   :  { %773 = vmatmul.msk.f32.vlgmr.msra.gmra.mxu3 %vm352_vm2, %v341_v29 }
 0x17f   :  { %v285_v32 = vpop.permute.xlu1 %284 }
 0x180   :  { %v253_v34 = vpop.permute.xlu0 %252  ;;  %302 = vst.msk [vmem:[#allocation2 + $0x33] sm:$0x1] %vm96_vm1, %v285_v32  ;;  %v351_v35 = vld [vmem:[#allocation2 + $0x38] sm:$0xff] }
 0x181   :  { %270 = vst.msk [vmem:[#allocation2 + $0x36] sm:$0x1] %vm96_vm1, %v253_v34  ;;  %532 = vmatpush.msra.mxu2 %v351_v35  ;;  %vm624_vm1 = vcmask 195714  }
 0x182   :  { %775 = vmatmul.msk.f32.vlgmr.msra.gmra.mxu2 %vm352_vm2, %v343_v33 }
 0x188   :  { %v350_v37 = vld [vmem:[#allocation2 + $0x30] sm:$0xff] }
 0x189   :  { %509 = vmatpush.msrb.mxu1 %v350_v37 }
 0x18a   :  { %774 = vmatmul.msk.f32.vlgmr.msrb.gmra.mxu1 %vm352_vm2, %v342_v36 }
 0x1cf   :  { %v1020_v38 = vpop.f32.mrf.mxu1 }
 0x1dd   :  { %v396_v39 = vpop.f32.mrf.mxu2 }
 0x1de   :  { %v545_v40 = vrot.slane %v396_v39, 7 }
 0x1df   :  { %v419_v41 = vpop.f32.mrf.mxu1 }
 0x1e0   :  { %v1022_v42 = vrot.slane %v419_v41, 6  ;;  %v596_v43 = vsel %vm561_vm3, %v545_v40, %v1020_v38  ;;  %v628_v44 = vsel %vm564_vm4, %v545_v40, %v1020_v38  ;;  %v644_v46 = vsel %vm555_vm5, %v545_v40, %v1020_v38 }
 0x1e1   :  { %634 = vrot.lane.b32.xlu2 %v628_v44, %s823_s8  ;;  %v568_v48 = vsel %vm558_vm6, %v545_v40, %v1020_v38  ;;  %v612_v57 = vsel %vm552_vm8, %v545_v40, %v1020_v38  ;;  %v580_v63 = vsel %vm549_vm9, %v545_v40, %v1020_v38  ;;  %v547_v1 = vsel %vm546_vm10, %v545_v40, %v1020_v38 }
 0x1e2   :  { %v597_v45 = vsel %vm564_vm4, %v1022_v42, %v596_v43  ;;  %v645_v51 = vsel %vm558_vm6, %v1022_v42, %v644_v46  ;;  %v569_v53 = vsel %vm561_vm3, %v1022_v42, %v568_v48  ;;  %v613_v58 = vsel %vm555_vm5, %v1022_v42, %v612_v57  ;;  %v678_v43 = vld [vmem:[%s1141_s3] sm:$0xff] }
 0x1e3   :  { %602 = vrot.lane.b32.xlu0 %v597_v45, %s819_s21  ;;  %v581_v2 = vsel %vm552_vm8, %v1022_v42, %v580_v63  ;;  %v550_v3 = vsel %vm549_vm9, %v1022_v42, %v547_v1  ;;  %v660_v8 = vsel %vm546_vm10, %v1022_v42, %v545_v40 }
 0x1ed   :  { %v465_v47 = vpop.f32.mrf.mxu2 }
 0x1ee   :  { %v1036_v50 = vrot.slane %v465_v47, 4 }
 0x1ef   :  { %v442_v49 = vpop.f32.mrf.mxu1 }
 0x1f0   :  { %v551_v52 = vrot.slane %v442_v49, 5 }
 0x1f2   :  { %v646_v54 = vsel %vm561_vm3, %v551_v52, %v645_v51  ;;  %v570_v56 = vsel %vm564_vm4, %v551_v52, %v569_v53  ;;  %v614_v59 = vsel %vm558_vm6, %v551_v52, %v613_v58  ;;  %v582_v5 = vsel %vm555_vm5, %v551_v52, %v581_v2 }
 0x1f3   :  { %v647_v55 = vsel %vm564_vm4, %v1036_v50, %v646_v54  ;;  %577 = vst.msk [vmem:[#allocation3 + $0x4] sm:$0xf0] %vm576_vm7, %v570_v56  ;;  %v615_v62 = vsel %vm561_vm3, %v1036_v50, %v614_v59  ;;  %v553_v9 = vsel %vm552_vm8, %v551_v52, %v550_v3  ;;  %v583_v11 = vsel %vm558_vm6, %v1036_v50, %v582_v5 }
 0x1f4   :  { %650 = vrot.lane.b32.xlu1 %v647_v55, %s824_s9  ;;  %v598_v12 = vsel %vm546_vm10, %v1036_v50, %v551_v52  ;;  %v661_v16 = vsel %vm549_vm9, %v551_v52, %v660_v8  ;;  %v556_v17 = vsel %vm555_vm5, %v1036_v50, %v553_v9  ;;  %v629_v32 = vsel %vm546_vm10, %v551_v52, %v1022_v42  ;;  %v679_v42 = vld [vmem:[%s1141_s3 + $0x8] sm:$0xff] }
 0x1f5   :  { %v662_v27 = vsel %vm552_vm8, %v1036_v50, %v661_v16  ;;  %v630_v34 = vsel %vm549_vm9, %v1036_v50, %v629_v32  ;;  %738 = vmatpush.msrb.mxu2 %v679_v42  ;;  %780 = vmatpush.msrb.mxu3 %v679_v42  ;;  %vm642_vm7 = vcmask 193664  }
 0x1f7   :  { %739 = vmatpush.msrb.mxu2 %v678_v43  ;;  %781 = vmatpush.msrb.mxu3 %v678_v43 }
 0x1fd   :  { %v488_v60 = vpop.f32.mrf.mxu3 }
 0x1fe   :  { %v557_v61 = vrot.slane %v488_v60, 3 }
 0x200   :  { %v616_v0 = vsel %vm564_vm4, %v557_v61, %v615_v62  ;;  %v584_v13 = vsel %vm561_vm3, %v557_v61, %v583_v11  ;;  %v599_v19 = vsel %vm549_vm9, %v557_v61, %v598_v12  ;;  %v559_v20 = vsel %vm558_vm6, %v557_v61, %v556_v17 }
 0x201   :  { %618 = vrot.lane.b32.xlu2 %v616_v0, %s823_s8  ;;  %v571_v21 = vsel %vm546_vm10, %v557_v61, %v1036_v50  ;;  %v663_v29 = vsel %vm555_vm5, %v557_v61, %v662_v27  ;;  %v631_v35 = vsel %vm552_vm8, %v557_v61, %v630_v34 }
 0x205   :  { %v534_v4 = vpop.f32.mrf.mxu2 }
 0x206   :  { %v563_v6 = vrot.slane %v534_v4, 1 }
 0x207   :  { %v511_v7 = vpop.f32.mrf.mxu1 }
 0x208   :  { %v560_v10 = vrot.slane %v511_v7, 2  ;;  %588 = vrot.lane.b32.xlu1 %v563_v6, %s819_s21 }
 0x20a   :  { %v585_v14 = vsel %vm564_vm4, %v560_v10, %v584_v13  ;;  %v648_v15 = vsel %vm546_vm10, %v560_v10, %v557_v61  ;;  %v600_v22 = vsel %vm552_vm8, %v560_v10, %v599_v19  ;;  %v562_v23 = vsel %vm561_vm3, %v560_v10, %v559_v20 }
 0x20b   :  { %586 = vrot.lane.b32.xlu0 %v585_v14, %s819_s21  ;;  %v649_v18 = vsel %vm549_vm9, %v563_v6, %v648_v15  ;;  %v572_v24 = vsel %vm549_vm9, %v560_v10, %v571_v21  ;;  %v565_v25 = vsel %vm564_vm4, %v563_v6, %v562_v23  ;;  %v601_v28 = vsel %vm555_vm5, %v563_v6, %v600_v22 }
 0x20c   :  { %652 = vrot.lane.b32.xlu2 %v649_v18, %s824_s9  ;;  %v573_v26 = vsel %vm552_vm8, %v563_v6, %v572_v24  ;;  %567 = vst.msk [vmem:[#allocation3] sm:$0xff] %vm352_vm2, %v565_v25  ;;  %v664_v30 = vsel %vm558_vm6, %v560_v10, %v663_v29  ;;  %v617_v31 = vsel %vm546_vm10, %v563_v6, %v560_v10  ;;  %vm656_vm2 = vcmask 261315  }
 0x20d   :  { %579 = vst.msk [vmem:[#allocation3 + $0xc] sm:$0xf] %vm578_vm11, %v573_v26  ;;  %v665_v33 = vsel %vm561_vm3, %v563_v6, %v664_v30  ;;  %v632_v36 = vsel %vm555_vm5, %v560_v10, %v631_v35  ;;  %vm610_vm3 = vcmask 127040   ;;  %vm626_vm4 = vcmask 189568  }
 0x20e   :  { %v633_v37 = vsel %vm558_vm6, %v563_v6, %v632_v36  ;;  %vm658_vm5 = vcmask 256192   ;;  %vm672_vm6 = vcmask 261319   ;;  %vm674_vm8 = vcmask 260288  }
 0x210   :  { %604 = vrot.lane.b32.xlu1 %v601_v28, %s819_s21 }
 0x213   :  { %620 = vrot.lane.b32.xlu0 %v617_v31, %s823_s8 }
 0x214   :  { %668 = vrot.lane.b32.xlu2 %v665_v33, %s824_s9 }
 0x218   :  { %666 = vrot.lane.b32.xlu1 %v1020_v38, %s824_s9 }
 0x21b   :  { %636 = vrot.lane.b32.xlu0 %v633_v37, %s823_s8 }
 0x23b   :  { %v635_v40 = vpop.permute.xlu2 %634 }
 0x255   :  { %v603_v39 = vpop.permute.xlu0 %602 }
 0x256   :  { %609 = vst.msk [vmem:[#allocation3 + $0x3] sm:$0xe0] %vm608_vm12, %v603_v39 }
 0x257   :  { %641 = vst.msk [vmem:[#allocation3 + $0x2] sm:$0xc0] %vm640_vm13, %v635_v40 }
 0x25b   :  { %v619_v44 = vpop.permute.xlu2 %618 }
 0x266   :  { %v651_v41 = vpop.permute.xlu1 %650  ;;  %v653_v47 = vpop.permute.xlu2 %652 }
 0x26e   :  { %v669_v51 = vpop.permute.xlu2 %668 }
 0x27a   :  { %v589_v38 = vpop.permute.xlu1 %588 }
 0x27b   :  { %595 = vst.msk [vmem:[#allocation3 + $0x7] sm:$0x1] %vm594_vm14, %v589_v38 }
 0x27d   :  { %v587_v45 = vpop.permute.xlu0 %586 }
 0x27e   :  { %593 = vst.msk [vmem:[#allocation3 - $0x1] sm:$0xfe] %vm592_vm15, %v587_v45 }
 0x27f   :  { %625 = vst.msk [vmem:[#allocation3 - $0x2] sm:$0xfc] %vm624_vm1, %v619_v44 }
 0x280   :  { %657 = vst.msk [vmem:[#allocation3 - $0x3] sm:$0xf8] %vm656_vm2, %v651_v41 }
 0x282   :  { %v605_v46 = vpop.permute.xlu1 %604 }
 0x283   :  { %611 = vst.msk [vmem:[#allocation3 + $0xb] sm:$0x1f] %vm610_vm3, %v605_v46 }
 0x285   :  { %v621_v48 = vpop.permute.xlu0 %620 }
 0x286   :  { %627 = vst.msk [vmem:[#allocation3 + $0x6] sm:$0x3] %vm626_vm4, %v621_v48 }
 0x287   :  { %659 = vst.msk [vmem:[#allocation3 + $0x5] sm:$0x7] %vm658_vm5, %v653_v47 }
 0x28a   :  { %v667_v49 = vpop.permute.xlu1 %666 }
 0x28b   :  { %673 = vst.msk [vmem:[#allocation3 + $0x1] sm:$0x80] %vm672_vm6, %v667_v49 }
 0x28d   :  { %v637_v50 = vpop.permute.xlu0 %636 }
 0x28e   :  { %643 = vst.msk [vmem:[#allocation3 + $0xa] sm:$0x3f] %vm642_vm7, %v637_v50  ;;  %v676_v52 = vld [vmem:[#allocation3] sm:$0xff] }
 0x28f   :  { %675 = vst.msk [vmem:[#allocation3 + $0x9] sm:$0x7f] %vm674_vm8, %v669_v51  ;;  %680 = vxpose.xlu0.b32.start [1/2] (short) (narrow) %v676_v52, 32 }
 0x296   :  { %v677_v53 = vld [vmem:[#allocation3 + $0x8] sm:$0xff] }
 0x297   :  { %681 = vxpose.xlu0.b32.end [2/2] (short) (narrow) %v677_v53, 32 }
 0x333   :  { %v696_v54 = vpop.trf.xlu0 }
 0x334   :  { %776 = vmatmul.msk.f32.vlgmr.msrb.gmra.mxu2 %vm39_vm0, %v696_v54 }
 0x33b   :  { %v697_v55 = vpop.trf.xlu0 }
 0x33c   :  { %777 = vmatmul.msk.f32.vlgmr.msrb.gmra.mxu3 %vm39_vm0, %v697_v55 }
 0x343   :  { %v698_v56 = vpop.trf.xlu0 }
 0x344   :  { %778 = vmatmul.msk.f32.gmra.mxu3 %vm39_vm0, %v698_v56 }
 0x34b   :  { %v699_v57 = vpop.trf.xlu0 }
 0x34c   :  { %779 = vmatmul.msk.f32.gmra.mxu3 %vm39_vm0, %v699_v57 }
 0x3b7   :  { %v741_v58 = vpop.f32.mrf.mxu2 }
 0x3b8   :  { %753 = vst.msk [vmem:[%s1142_s4] sm:$0xff] %vm39_vm0, %v741_v58 }
 0x3bf   :  { %v744_v59 = vpop.f32.mrf.mxu3 }
 0x3c0   :  { %754 = vst.msk [vmem:[%s1142_s4 + $0x8] sm:$0xff] %vm39_vm0, %v744_v59 }
 0x3c7   :  { %v747_v60 = vpop.f32.mrf.mxu3 }
 0x3c8   :  { %755 = vst.msk [vmem:[%s1142_s4 + $0x10] sm:$0xff] %vm39_vm0, %v747_v60 }
 0x3cf   :  { %v750_v61 = vpop.f32.mrf.mxu3 }
 0x3d0   :  { %756 = vst.msk [vmem:[%s1142_s4 + $0x18] sm:$0xff] %vm39_vm0, %v750_v61 }
 0x3d1   :  { %761 = vsyncpa [#allocation5], 1 }

</bundles_post_ra>
